<compile_context>
chip_gen: v5e
topology: v5e:2x2
jax: 0.10.0
libtpu: 0.0.40
codegen_flags: <defaults>
</compile_context>

<pallas_src>
import functools

import numpy as np
import jax
import jax.numpy as jnp
from jax import lax
from jax.experimental import pallas as pl
from jax.experimental.pallas import tpu as pltpu


# --------------------------- kernel 1: prologue ------------------------------
def _egp_prologue_kernel(x_ref, w1_ref, b1_ref, w2s_ref, w2e_ref, b2s_ref,
                         b2e_ref, sc_ref,
                         qr_ref, kr_ref, bs_ref, be_ref, *, head_size):
    """grid = (B,).  dense1 -> RoPE -> dense2 biases (O(N*H) work per batch).

    x_ref   : [1, N, H]      padded input sequence
    w1_ref  : [H, 2*HS]      dense1 weights, columns ordered [qe|qo|ke|ko]
    b1_ref  : [1, 2*HS]
    w2s_ref : [2*HS, heads]  dense2 "start"-head weights (rows match w1 order)
    w2e_ref : [2*HS, heads]  dense2 "end"-head weights
    b2s_ref : [1, heads]
    b2e_ref : [1, heads]
    sc_ref  : [2, N, HS/2]   RoPE (sin, cos) tables
    qr_ref  : [1, N, HS]     out: RoPE'd Q, pre-scaled by 1/sqrt(HS)
    kr_ref  : [1, N, HS]     out: RoPE'd K
    bs_ref  : [1, N, heads]  out: 0.5 * dense2 "start" bias
    be_ref  : [1, N, heads]  out: 0.5 * dense2 "end" bias
    """
    f32 = jnp.float32
    hs2 = head_size // 2
    inv_sqrt = 1.0 / (head_size ** 0.5)

    x = x_ref[0]                                                    # [N, H]
    # fused dense1: one wide MXU matmul, columns [qe | qo | ke | ko]
    h = jnp.dot(x, w1_ref[...], preferred_element_type=f32) + b1_ref[...]
    sin = sc_ref[0]                                                 # [N, HS/2]
    cos = sc_ref[1]
    qe = h[:, 0 * hs2:1 * hs2]
    qo = h[:, 1 * hs2:2 * hs2]
    ke = h[:, 2 * hs2:3 * hs2]
    ko = h[:, 3 * hs2:4 * hs2]
    # RoPE on even/odd halves; Q/K stored as [N, HS] = [even_r | odd_r]
    qr = jnp.concatenate([qe * cos - qo * sin, qo * cos + qe * sin], axis=1)
    kr = jnp.concatenate([ke * cos - ko * sin, ko * cos + ke * sin], axis=1)
    qr_ref[0] = (qr * inv_sqrt).astype(qr_ref.dtype)   # fold 1/sqrt(HS) into Q
    kr_ref[0] = kr.astype(kr_ref.dtype)

    # dense2 sees the pre-RoPE dense1 output (torch semantics), scaled by 1/2.
    hc = h.astype(w2s_ref.dtype)
    bs_ref[0] = (0.5 * (jnp.dot(hc, w2s_ref[...], preferred_element_type=f32)
                        + b2s_ref[...])).astype(bs_ref.dtype)
    be_ref[0] = (0.5 * (jnp.dot(hc, w2e_ref[...], preferred_element_type=f32)
                        + b2e_ref[...])).astype(be_ref.dtype)


# ----------------------- kernel 2: N^2 logits tiles ---------------------------
def _egp_logits_kernel(qr_ref, krt_ref, bs_ref, be_ref, mrow_ref, mcol_ref,
                       out_ref, *, heads, block_m, block_n):
    """grid = (B, N_pad//TM, N_pad//TN); every grid point is independent.

    qr_ref  : [1, TM, HS]       RoPE'd, pre-scaled Q rows
    krt_ref : [1, HS, TN]       RoPE'd K, pre-transposed
    bs_ref  : [1, heads, TN]    "start" bias (lane vector -> sublane broadcast)
    be_ref  : [1, TM, heads]    "end"   bias (sublane vector -> lane broadcast)
    mrow_ref: [1, 1, TN]        attention mask, column slice
    mcol_ref: [1, TM, 1]        attention mask, row slice
    out_ref : [1, heads, TM, TN]
    """
    f32 = jnp.float32
    row0 = pl.program_id(1) * block_m
    col0 = pl.program_id(2) * block_n

    # One MXU matmul per tile; Q already carries the 1/sqrt(HS) scale.
    qk = jnp.dot(qr_ref[0], krt_ref[0], preferred_element_type=f32)  # [TM, TN]

    # Fused attention-mask + strict-lower-triangle penalty, applied ONCE
    # (head-independent), matching the reference's additive -1e12 masks.
    mrow = mrow_ref[0]                                               # [1, TN]
    mcol = mcol_ref[0]                                               # [TM, 1]
    rid = row0 + lax.broadcasted_iota(jnp.int32, (block_m, block_n), 0)
    cid = col0 + lax.broadcasted_iota(jnp.int32, (block_m, block_n), 1)
    pen = ((1.0 - mcol * mrow) + (rid > cid).astype(f32)) * 1e12
    base = qk - pen                                                  # [TM, TN]

    bs = bs_ref[0]                                                   # [heads, TN]
    be = be_ref[0]                                                   # [TM, heads]
    # Per-head stores: no heads*TM*TN temporary; the two bias broadcasts are a
    # sublane broadcast ([1,TN]) and a lane broadcast ([TM,1]) -- no per-tile
    # transposes anywhere in the steady state.
    for h in range(heads):
        out_ref[0, h, :, :] = (base + bs[h:h + 1, :] + be[:, h:h + 1]
                               ).astype(out_ref.dtype)


# ------------------------------ helpers --------------------------------------
def _pick_tile(preferred, n_pad):
    """Largest multiple of 128 <= preferred that divides n_pad."""
    t = min(int(preferred), n_pad)
    t = max(128, (t // 128) * 128)
    while n_pad % t:
        t -= 128
    return t


def _vmem_limit_bytes():
    """Derive the scoped-VMEM limit from the chip (review: don't hard-code 48MiB)."""
    cap = None
    try:
        info = pltpu.get_tpu_info()
        for name in ("vmem_capacity_bytes", "vmem_size_bytes", "vmem_bytes"):
            cap = getattr(info, name, None)
            if cap:
                break
    except Exception:
        cap = None
    if not cap:
        return 48 * 1024 * 1024          # safe on v7x (64 MiB) and everything else
    return int(min(cap * 3 // 4, 112 * 1024 * 1024))


# ------------------------------ JAX wrapper ----------------------------------
def efficient_global_pointer(x, w1t, b1, w2t, b2, attention_mask=None, *,
                             heads, head_size, block_m=256, block_n=512,
                             compute_dtype=jnp.bfloat16, out_dtype=jnp.bfloat16,
                             return_padded=False):
    """EfficientGlobalPointer forward.

    x: [B, N, H]; w1t: [H, 2*head_size]; w2t: [2*head_size, 2*heads]
    (torch nn.Linear computes y = x @ W^T + b; w1t/w2t are the transposed weights).

    compute_dtype/out_dtype default to bfloat16 (fast MXU path, half the HBM
    writeback of the [B, heads, N, N] logits).  Pass float32 for tight
    comparisons against the float32 reference.

    return_padded=True returns [B, heads, N_pad, N_pad] (N_pad = ceil(N/128)*128)
    so the consumer can fuse the un-pad slice/mask; the default slices back to
    the module's [B, heads, N, N] (which costs a copy when N % 128 != 0).
    """
    f32 = jnp.float32
    B, N, H = x.shape
    HS = int(head_size)
    HS2 = HS // 2
    assert HS % 2 == 0
    heads = int(heads)

    N_pad = pl.cdiv(N, 128) * 128
    pad = N_pad - N

    x_pad = jnp.pad(x.astype(compute_dtype), ((0, 0), (0, pad), (0, 0)))

    if attention_mask is None:
        attention_mask = jnp.ones((B, N), dtype=f32)
    mask = jnp.pad(attention_mask.astype(f32), ((0, 0), (0, pad)))
    mrow = mask[:, None, :]                                      # [B, 1, N_pad]
    mcol = mask[:, :, None]                                      # [B, N_pad, 1]

    w1t = w1t.astype(f32); b1 = b1.astype(f32)
    w2t = w2t.astype(f32); b2 = b2.astype(f32)

    # dense1: de-interleave columns into [qe | qo | ke | ko] so the prologue
    # does ONE wide matmul and only contiguous slices.
    wq, wk = w1t[:, 0::2], w1t[:, 1::2]
    w1cat = jnp.concatenate([wq[:, 0::2], wq[:, 1::2], wk[:, 0::2], wk[:, 1::2]],
                            axis=1)                              # [H, 2*HS]
    bq, bk = b1[0::2], b1[1::2]
    b1cat = jnp.concatenate([bq[0::2], bq[1::2], bk[0::2], bk[1::2]])[None, :]

    # dense2: reorder rows identically; split columns into "start"/"end" heads.
    w2q_rows, w2k_rows = w2t[0::2, :], w2t[1::2, :]
    w2rows = jnp.concatenate([w2q_rows[0::2], w2q_rows[1::2],
                              w2k_rows[0::2], w2k_rows[1::2]], axis=0)  # [2HS, 2*heads]
    w2s, w2e = w2rows[:, 0::2], w2rows[:, 1::2]                  # [2*HS, heads]
    b2s, b2e = b2[0::2][None, :], b2[1::2][None, :]              # [1, heads]

    # RoPE sin/cos tables.
    pos = jnp.arange(N_pad, dtype=f32)
    inv_freq = jnp.power(10000.0, -2.0 * jnp.arange(HS2, dtype=f32) / HS)
    ang = pos[:, None] * inv_freq[None, :]
    sincos = jnp.stack([jnp.sin(ang), jnp.cos(ang)], axis=0)     # [2, N_pad, HS2]

    vmem_limit = _vmem_limit_bytes()

    # ---- kernel 1: per-batch prologue (dense1 + RoPE + dense2 biases) -------
    qr, kr, bsr, ber = pl.pallas_call(
        functools.partial(_egp_prologue_kernel, head_size=HS),
        out_shape=(
            jax.ShapeDtypeStruct((B, N_pad, HS), compute_dtype),     # RoPE'd Q (scaled)
            jax.ShapeDtypeStruct((B, N_pad, HS), compute_dtype),     # RoPE'd K
            jax.ShapeDtypeStruct((B, N_pad, heads), f32),            # start bias
            jax.ShapeDtypeStruct((B, N_pad, heads), f32),            # end bias
        ),
        grid_spec=pltpu.PrefetchScalarGridSpec(
            num_scalar_prefetch=0,
            grid=(B,),
            in_specs=[
                pl.BlockSpec((1, N_pad, H), lambda b: (b, 0, 0)),        # x
                pl.BlockSpec((H, 2 * HS), lambda b: (0, 0)),             # w1cat
                pl.BlockSpec((1, 2 * HS), lambda b: (0, 0)),             # b1cat
                pl.BlockSpec((2 * HS, heads), lambda b: (0, 0)),         # w2 start
                pl.BlockSpec((2 * HS, heads), lambda b: (0, 0)),         # w2 end
                pl.BlockSpec((1, heads), lambda b: (0, 0)),              # b2 start
                pl.BlockSpec((1, heads), lambda b: (0, 0)),              # b2 end
                pl.BlockSpec((2, N_pad, HS2), lambda b: (0, 0, 0)),      # sin/cos
            ],
            out_specs=[
                pl.BlockSpec((1, N_pad, HS), lambda b: (b, 0, 0)),
                pl.BlockSpec((1, N_pad, HS), lambda b: (b, 0, 0)),
                pl.BlockSpec((1, N_pad, heads), lambda b: (b, 0, 0)),
                pl.BlockSpec((1, N_pad, heads), lambda b: (b, 0, 0)),
            ],
        ),
        compiler_params=pltpu.CompilerParams(
            dimension_semantics=("parallel",),
            vmem_limit_bytes=vmem_limit,
        ),
    )(x_pad, w1cat.astype(compute_dtype), b1cat,
      w2s.astype(compute_dtype), w2e.astype(compute_dtype), b2s, b2e, sincos)

    # Layout plumbing between the kernels (O(N*(HS+heads)) per batch, negligible
    # vs the N^2 output): present K transposed and the start bias in [heads, N]
    # so the hot loop has ZERO per-tile XLU transposes.
    krt = jnp.swapaxes(kr, 1, 2)                                 # [B, HS, N_pad]
    bst = jnp.swapaxes(bsr, 1, 2)                                # [B, heads, N_pad]

    tm = _pick_tile(block_m, N_pad)
    tn = _pick_tile(block_n, N_pad)

    # ---- kernel 2: [B, heads, N, N] logits as lane-dense [1,heads,TM,TN] tiles
    out = pl.pallas_call(
        functools.partial(_egp_logits_kernel, heads=heads, block_m=tm, block_n=tn),
        out_shape=jax.ShapeDtypeStruct((B, heads, N_pad, N_pad), out_dtype),
        grid_spec=pltpu.PrefetchScalarGridSpec(
            num_scalar_prefetch=0,
            grid=(B, N_pad // tm, N_pad // tn),
            in_specs=[
                pl.BlockSpec((1, tm, HS), lambda b, m, n: (b, m, 0)),     # Q rows
                pl.BlockSpec((1, HS, tn), lambda b, m, n: (b, 0, n)),     # K^T cols
                pl.BlockSpec((1, heads, tn), lambda b, m, n: (b, 0, n)),  # start bias
                pl.BlockSpec((1, tm, heads), lambda b, m, n: (b, m, 0)),  # end bias
                pl.BlockSpec((1, 1, tn), lambda b, m, n: (b, 0, n)),      # mask (cols)
                pl.BlockSpec((1, tm, 1), lambda b, m, n: (b, m, 0)),      # mask (rows)
            ],
            out_specs=pl.BlockSpec((1, heads, tm, tn),
                                   lambda b, m, n: (b, 0, m, n)),
        ),
        compiler_params=pltpu.CompilerParams(
            # No cross-iteration state left: all axes parallel (megacore on v7x
            # even when B == 1).
            dimension_semantics=("parallel", "parallel", "parallel"),
            vmem_limit_bytes=vmem_limit,
        ),
    )(qr, krt, bst, ber, mrow, mcol)

    if return_padded:
        return out
    return out[:, :, :N, :N]


# ------------------------- pure-JAX reference (torch semantics) --------------
def reference(x, w1t, b1, w2t, b2, attention_mask, *, heads, head_size):
    B, N, H = x.shape
    D = head_size
    h = x @ w1t + b1                                  # dense1: [B, N, 2D]
    qw, kw = h[..., ::2], h[..., 1::2]
    pos_ids = jnp.arange(N, dtype=x.dtype)
    idx = jnp.power(10000.0, -2.0 * jnp.arange(D // 2, dtype=x.dtype) / D)
    emb = jnp.einsum('n,d->nd', pos_ids, idx)
    pos = jnp.stack([jnp.sin(emb), jnp.cos(emb)], axis=-1).reshape(N, D)[None]
    cos_pos = jnp.repeat(pos[..., 1::2], 2, axis=-1)
    sin_pos = jnp.repeat(pos[..., 0::2], 2, axis=-1)
    qw2 = jnp.stack([-qw[..., 1::2], qw[..., ::2]], axis=-1).reshape(qw.shape)
    qw_r = qw * cos_pos + qw2 * sin_pos
    kw2 = jnp.stack([-kw[..., 1::2], kw[..., ::2]], axis=-1).reshape(kw.shape)
    kw_r = kw * cos_pos + kw2 * sin_pos
    logits = jnp.einsum('bmd,bnd->bmn', qw_r, kw_r) / D ** 0.5
    bias = (h @ w2t + b2).transpose(0, 2, 1) / 2      # [B, 2*heads, N]
    logits = logits[:, None] + bias[:, ::2, None] + bias[:, 1::2, :, None]
    if attention_mask is not None:
        attn_mask = 1 - attention_mask[:, None, None, :] * attention_mask[:, None, :, None]
        logits = logits - attn_mask * 1e12
    mask = jnp.tril(jnp.ones_like(logits), k=-1)
    logits = logits - mask * 1e12
    return logits


if __name__ == "__main__":
    B, N, H = 2, 8, 32          # batch, seq, hidden
    heads, head_size = 4, 16

    key = jax.random.PRNGKey(0)
    k1, k2, k3, k4, k5, k6 = jax.random.split(key, 6)
    x = jax.random.normal(k1, (B, N, H), jnp.float32)
    # torch Linear: y = x @ W^T + b; we build W^T directly
    w1t = jax.random.normal(k2, (H, 2 * head_size), jnp.float32) * 0.05
    b1 = jax.random.normal(k3, (2 * head_size,), jnp.float32) * 0.05
    w2t = jax.random.normal(k4, (2 * head_size, 2 * heads), jnp.float32) * 0.05
    b2 = jax.random.normal(k5, (2 * heads,), jnp.float32) * 0.05
    attention_mask = (jax.random.uniform(k6, (B, N)) > 0.2).astype(jnp.float32)

    # float32 path + padded output for a tight check against the reference.
    # The un-pad slice is performed by the consumer (here: on host), which is
    # the recommended pattern for avoiding an extra full-tensor XLA copy.
    out_pad = efficient_global_pointer(
        x, w1t, b1, w2t, b2, attention_mask, heads=heads, head_size=head_size,
        compute_dtype=jnp.float32, out_dtype=jnp.float32, return_padded=True)
    out_pad = jax.block_until_ready(out_pad)
    out = np.asarray(out_pad)[:, :, :N, :N]

    ref = reference(x, w1t, b1, w2t, b2, attention_mask,
                    heads=heads, head_size=head_size)
    np.testing.assert_allclose(out, np.asarray(ref), rtol=1e-3, atol=1e-3)

    # Exercise the recommended fast path (bf16 compute + bf16 logits) once.
    out_fast = efficient_global_pointer(x, w1t, b1, w2t, b2, attention_mask,
                                        heads=heads, head_size=head_size)
    jax.block_until_ready(out_fast)

    print("KERNEL_OK")
</pallas_src>

<mosaic_0001>
module attributes {stable_mosaic.version = 11 : i64} {
  func.func @_egp_prologue_kernel(%arg0: i32, %arg1: memref<1x128x32xf32, #tpu.memory_space<vmem>>, %arg2: memref<32x32xf32, #tpu.memory_space<vmem>>, %arg3: memref<1x32xf32, #tpu.memory_space<vmem>>, %arg4: memref<32x4xf32, #tpu.memory_space<vmem>>, %arg5: memref<32x4xf32, #tpu.memory_space<vmem>>, %arg6: memref<1x4xf32, #tpu.memory_space<vmem>>, %arg7: memref<1x4xf32, #tpu.memory_space<vmem>>, %arg8: memref<2x128x8xf32, #tpu.memory_space<vmem>>, %arg9: memref<1x128x16xf32, #tpu.memory_space<vmem>>, %arg10: memref<1x128x16xf32, #tpu.memory_space<vmem>>, %arg11: memref<1x128x4xf32, #tpu.memory_space<vmem>>, %arg12: memref<1x128x4xf32, #tpu.memory_space<vmem>>) attributes {dimension_semantics = [#tpu.dimension_semantics<parallel>], iteration_bounds = array<i64: 2>, scalar_prefetch = 0 : i64, scratch_operands = 0 : i64, tpu.core_type = #tpu.core_type<tc>, window_params = [{transform_indices = @transform_0, window_bounds = array<i64: 1, 128, 32>}, {pipeline_mode = #tpu.pipeline_mode<synchronous>, transform_indices = @transform_1, window_bounds = array<i64: 32, 32>}, {pipeline_mode = #tpu.pipeline_mode<synchronous>, transform_indices = @transform_2, window_bounds = array<i64: 1, 32>}, {pipeline_mode = #tpu.pipeline_mode<synchronous>, transform_indices = @transform_3, window_bounds = array<i64: 32, 4>}, {pipeline_mode = #tpu.pipeline_mode<synchronous>, transform_indices = @transform_4, window_bounds = array<i64: 32, 4>}, {pipeline_mode = #tpu.pipeline_mode<synchronous>, transform_indices = @transform_5, window_bounds = array<i64: 1, 4>}, {pipeline_mode = #tpu.pipeline_mode<synchronous>, transform_indices = @transform_6, window_bounds = array<i64: 1, 4>}, {pipeline_mode = #tpu.pipeline_mode<synchronous>, transform_indices = @transform_7, window_bounds = array<i64: 2, 128, 8>}, {transform_indices = @transform_8, window_bounds = array<i64: 1, 128, 16>}, {transform_indices = @transform_9, window_bounds = array<i64: 1, 128, 16>}, {transform_indices = @transform_10, window_bounds = array<i64: 1, 128, 4>}, {transform_indices = @transform_11, window_bounds = array<i64: 1, 128, 4>}]} {
    %c0 = arith.constant 0 : index
    %c0_0 = arith.constant 0 : index
    %c0_1 = arith.constant 0 : index
    %0 = vector.load %arg1[%c0, %c0_0, %c0_1] : memref<1x128x32xf32, #tpu.memory_space<vmem>>, vector<1x128x32xf32>
    %1 = vector.shape_cast %0 : vector<1x128x32xf32> to vector<128x32xf32>
    %c0_2 = arith.constant 0 : index
    %c0_3 = arith.constant 0 : index
    %2 = vector.load %arg2[%c0_2, %c0_3] : memref<32x32xf32, #tpu.memory_space<vmem>>, vector<32x32xf32>
    %cst = arith.constant dense<0.000000e+00> : vector<128x32xf32>
    %3 = tpu.matmul %1, %2, %cst {dimension_numbers = #tpu.dot_dimension_numbers<[1], [0], [0], [1], [0, 0, 1, 1], [], []>} : vector<128x32xf32>, vector<32x32xf32>, vector<128x32xf32> -> vector<128x32xf32>
    %c0_4 = arith.constant 0 : index
    %c0_5 = arith.constant 0 : index
    %4 = vector.load %arg3[%c0_4, %c0_5] : memref<1x32xf32, #tpu.memory_space<vmem>>, vector<1x32xf32>
    %5 = vector.broadcast %4 : vector<1x32xf32> to vector<128x32xf32>
    %6 = arith.addf %3, %5 : vector<128x32xf32>
    %c0_6 = arith.constant 0 : index
    %c0_7 = arith.constant 0 : index
    %c0_8 = arith.constant 0 : index
    %7 = vector.load %arg8[%c0_6, %c0_7, %c0_8] : memref<2x128x8xf32, #tpu.memory_space<vmem>>, vector<1x128x8xf32>
    %8 = vector.shape_cast %7 : vector<1x128x8xf32> to vector<128x8xf32>
    %c1 = arith.constant 1 : index
    %c0_9 = arith.constant 0 : index
    %c0_10 = arith.constant 0 : index
    %9 = vector.load %arg8[%c1, %c0_9, %c0_10] : memref<2x128x8xf32, #tpu.memory_space<vmem>>, vector<1x128x8xf32>
    %10 = vector.shape_cast %9 : vector<1x128x8xf32> to vector<128x8xf32>
    %11 = vector.extract_strided_slice %6 {offsets = [0, 0], sizes = [128, 8], strides = [1, 1]} : vector<128x32xf32> to vector<128x8xf32>
    %12 = vector.extract_strided_slice %6 {offsets = [0, 8], sizes = [128, 8], strides = [1, 1]} : vector<128x32xf32> to vector<128x8xf32>
    %13 = vector.extract_strided_slice %6 {offsets = [0, 16], sizes = [128, 8], strides = [1, 1]} : vector<128x32xf32> to vector<128x8xf32>
    %14 = vector.extract_strided_slice %6 {offsets = [0, 24], sizes = [128, 8], strides = [1, 1]} : vector<128x32xf32> to vector<128x8xf32>
    %15 = arith.mulf %11, %10 : vector<128x8xf32>
    %16 = arith.mulf %12, %8 : vector<128x8xf32>
    %17 = arith.subf %15, %16 : vector<128x8xf32>
    %18 = arith.mulf %12, %10 : vector<128x8xf32>
    %19 = arith.mulf %11, %8 : vector<128x8xf32>
    %20 = arith.addf %18, %19 : vector<128x8xf32>
    %21 = tpu.concatenate %17, %20 in 1 : vector<128x8xf32>, vector<128x8xf32> -> vector<128x16xf32>
    %22 = arith.mulf %13, %10 : vector<128x8xf32>
    %23 = arith.mulf %14, %8 : vector<128x8xf32>
    %24 = arith.subf %22, %23 : vector<128x8xf32>
    %25 = arith.mulf %14, %10 : vector<128x8xf32>
    %26 = arith.mulf %13, %8 : vector<128x8xf32>
    %27 = arith.addf %25, %26 : vector<128x8xf32>
    %28 = tpu.concatenate %24, %27 in 1 : vector<128x8xf32>, vector<128x8xf32> -> vector<128x16xf32>
    %cst_11 = arith.constant 2.500000e-01 : f32
    %29 = vector.broadcast %cst_11 : f32 to vector<128x16xf32>
    %30 = arith.mulf %21, %29 : vector<128x16xf32>
    %c0_12 = arith.constant 0 : index
    %c0_13 = arith.constant 0 : index
    %c0_14 = arith.constant 0 : index
    %31 = vector.load %arg9[%c0_12, %c0_13, %c0_14] : memref<1x128x16xf32, #tpu.memory_space<vmem>>, vector<1x128x16xf32>
    %32 = vector.shape_cast %31 : vector<1x128x16xf32> to vector<128x16xf32>
    %33 = vector.shape_cast %30 : vector<128x16xf32> to vector<1x128x16xf32>
    tpu.vector_store %arg9[%c0_12, %c0_13, %c0_14], %33 {strides = array<i32>} : memref<1x128x16xf32, #tpu.memory_space<vmem>>, vector<1x128x16xf32>,
    %c0_15 = arith.constant 0 : index
    %c0_16 = arith.constant 0 : index
    %c0_17 = arith.constant 0 : index
    %34 = vector.load %arg10[%c0_15, %c0_16, %c0_17] : memref<1x128x16xf32, #tpu.memory_space<vmem>>, vector<1x128x16xf32>
    %35 = vector.shape_cast %34 : vector<1x128x16xf32> to vector<128x16xf32>
    %36 = vector.shape_cast %28 : vector<128x16xf32> to vector<1x128x16xf32>
    tpu.vector_store %arg10[%c0_15, %c0_16, %c0_17], %36 {strides = array<i32>} : memref<1x128x16xf32, #tpu.memory_space<vmem>>, vector<1x128x16xf32>,
    %c0_18 = arith.constant 0 : index
    %c0_19 = arith.constant 0 : index
    %37 = vector.load %arg4[%c0_18, %c0_19] : memref<32x4xf32, #tpu.memory_space<vmem>>, vector<32x4xf32>
    %cst_20 = arith.constant dense<0.000000e+00> : vector<128x4xf32>
    %38 = tpu.matmul %6, %37, %cst_20 {dimension_numbers = #tpu.dot_dimension_numbers<[1], [0], [0], [1], [0, 0, 1, 1], [], []>} : vector<128x32xf32>, vector<32x4xf32>, vector<128x4xf32> -> vector<128x4xf32>
    %c0_21 = arith.constant 0 : index
    %c0_22 = arith.constant 0 : index
    %39 = vector.load %arg6[%c0_21, %c0_22] : memref<1x4xf32, #tpu.memory_space<vmem>>, vector<1x4xf32>
    %40 = vector.broadcast %39 : vector<1x4xf32> to vector<128x4xf32>
    %41 = arith.addf %38, %40 : vector<128x4xf32>
    %cst_23 = arith.constant 5.000000e-01 : f32
    %42 = vector.broadcast %cst_23 : f32 to vector<128x4xf32>
    %43 = arith.mulf %42, %41 : vector<128x4xf32>
    %c0_24 = arith.constant 0 : index
    %c0_25 = arith.constant 0 : index
    %c0_26 = arith.constant 0 : index
    %44 = vector.load %arg11[%c0_24, %c0_25, %c0_26] : memref<1x128x4xf32, #tpu.memory_space<vmem>>, vector<1x128x4xf32>
    %45 = vector.shape_cast %44 : vector<1x128x4xf32> to vector<128x4xf32>
    %46 = vector.shape_cast %43 : vector<128x4xf32> to vector<1x128x4xf32>
    tpu.vector_store %arg11[%c0_24, %c0_25, %c0_26], %46 {strides = array<i32>} : memref<1x128x4xf32, #tpu.memory_space<vmem>>, vector<1x128x4xf32>,
    %c0_27 = arith.constant 0 : index
    %c0_28 = arith.constant 0 : index
    %47 = vector.load %arg5[%c0_27, %c0_28] : memref<32x4xf32, #tpu.memory_space<vmem>>, vector<32x4xf32>
    %cst_29 = arith.constant dense<0.000000e+00> : vector<128x4xf32>
    %48 = tpu.matmul %6, %47, %cst_29 {dimension_numbers = #tpu.dot_dimension_numbers<[1], [0], [0], [1], [0, 0, 1, 1], [], []>} : vector<128x32xf32>, vector<32x4xf32>, vector<128x4xf32> -> vector<128x4xf32>
    %c0_30 = arith.constant 0 : index
    %c0_31 = arith.constant 0 : index
    %49 = vector.load %arg7[%c0_30, %c0_31] : memref<1x4xf32, #tpu.memory_space<vmem>>, vector<1x4xf32>
    %50 = vector.broadcast %49 : vector<1x4xf32> to vector<128x4xf32>
    %51 = arith.addf %48, %50 : vector<128x4xf32>
    %cst_32 = arith.constant 5.000000e-01 : f32
    %52 = vector.broadcast %cst_32 : f32 to vector<128x4xf32>
    %53 = arith.mulf %52, %51 : vector<128x4xf32>
    %c0_33 = arith.constant 0 : index
    %c0_34 = arith.constant 0 : index
    %c0_35 = arith.constant 0 : index
    %54 = vector.load %arg12[%c0_33, %c0_34, %c0_35] : memref<1x128x4xf32, #tpu.memory_space<vmem>>, vector<1x128x4xf32>
    %55 = vector.shape_cast %54 : vector<1x128x4xf32> to vector<128x4xf32>
    %56 = vector.shape_cast %53 : vector<128x4xf32> to vector<1x128x4xf32>
    tpu.vector_store %arg12[%c0_33, %c0_34, %c0_35], %56 {strides = array<i32>} : memref<1x128x4xf32, #tpu.memory_space<vmem>>, vector<1x128x4xf32>,
    return
  }
  func.func @transform_0(%arg0: i32) -> (i32, i32, i32) {
    %c0_i32 = arith.constant 0 : i32
    %c0_i32_0 = arith.constant 0 : i32
    %c0_i32_1 = arith.constant 0 : i32
    return %arg0, %c0_i32, %c0_i32_0 : i32, i32, i32
  }
  func.func @transform_1(%arg0: i32) -> (i32, i32) {
    %c0_i32 = arith.constant 0 : i32
    %c0_i32_0 = arith.constant 0 : i32
    %c0_i32_1 = arith.constant 0 : i32
    return %c0_i32, %c0_i32_0 : i32, i32
  }
  func.func @transform_2(%arg0: i32) -> (i32, i32) {
    %c0_i32 = arith.constant 0 : i32
    %c0_i32_0 = arith.constant 0 : i32
    %c0_i32_1 = arith.constant 0 : i32
    return %c0_i32, %c0_i32_0 : i32, i32
  }
  func.func @transform_3(%arg0: i32) -> (i32, i32) {
    %c0_i32 = arith.constant 0 : i32
    %c0_i32_0 = arith.constant 0 : i32
    %c0_i32_1 = arith.constant 0 : i32
    return %c0_i32, %c0_i32_0 : i32, i32
  }
  func.func @transform_4(%arg0: i32) -> (i32, i32) {
    %c0_i32 = arith.constant 0 : i32
    %c0_i32_0 = arith.constant 0 : i32
    %c0_i32_1 = arith.constant 0 : i32
    return %c0_i32, %c0_i32_0 : i32, i32
  }
  func.func @transform_5(%arg0: i32) -> (i32, i32) {
    %c0_i32 = arith.constant 0 : i32
    %c0_i32_0 = arith.constant 0 : i32
    %c0_i32_1 = arith.constant 0 : i32
    return %c0_i32, %c0_i32_0 : i32, i32
  }
  func.func @transform_6(%arg0: i32) -> (i32, i32) {
    %c0_i32 = arith.constant 0 : i32
    %c0_i32_0 = arith.constant 0 : i32
    %c0_i32_1 = arith.constant 0 : i32
    return %c0_i32, %c0_i32_0 : i32, i32
  }
  func.func @transform_7(%arg0: i32) -> (i32, i32, i32) {
    %c0_i32 = arith.constant 0 : i32
    %c0_i32_0 = arith.constant 0 : i32
    %c0_i32_1 = arith.constant 0 : i32
    %c0_i32_2 = arith.constant 0 : i32
    return %c0_i32, %c0_i32_0, %c0_i32_1 : i32, i32, i32
  }
  func.func @transform_8(%arg0: i32) -> (i32, i32, i32) {
    %c0_i32 = arith.constant 0 : i32
    %c0_i32_0 = arith.constant 0 : i32
    %c0_i32_1 = arith.constant 0 : i32
    return %arg0, %c0_i32, %c0_i32_0 : i32, i32, i32
  }
  func.func @transform_9(%arg0: i32) -> (i32, i32, i32) {
    %c0_i32 = arith.constant 0 : i32
    %c0_i32_0 = arith.constant 0 : i32
    %c0_i32_1 = arith.constant 0 : i32
    return %arg0, %c0_i32, %c0_i32_0 : i32, i32, i32
  }
  func.func @transform_10(%arg0: i32) -> (i32, i32, i32) {
    %c0_i32 = arith.constant 0 : i32
    %c0_i32_0 = arith.constant 0 : i32
    %c0_i32_1 = arith.constant 0 : i32
    return %arg0, %c0_i32, %c0_i32_0 : i32, i32, i32
  }
  func.func @transform_11(%arg0: i32) -> (i32, i32, i32) {
    %c0_i32 = arith.constant 0 : i32
    %c0_i32_0 = arith.constant 0 : i32
    %c0_i32_1 = arith.constant 0 : i32
    return %arg0, %c0_i32, %c0_i32_0 : i32, i32, i32
  }
}

</mosaic_0001>

<bundles_post_ra>
// kernel: tpu_custom_call.1
= control target key start
LH: loop header
LB: loop body
LE: loop exit
PB: predicated region body
PF: predicated region fallthrough
CT: control target
= control target key end

     0   :  { %s2205_s17 = smov 0   ;;  %s3560_s0 = inlined_call_operand.vmem [shape: f32[2,128,32], index: 0, kind: input, shape index: {}]   ;;  %s3561_s1 = inlined_call_operand.vmem [shape: f32[32,32], index: 1, kind: input, shape index: {}]   ;;  %s3562_s2 = inlined_call_operand.vmem [shape: f32[1,32], index: 2, kind: input, shape index: {}]   ;;  %s3563_s3 = inlined_call_operand.vmem [shape: f32[32,4], index: 3, kind: input, shape index: {}]   ;;  %s3564_s4 = inlined_call_operand.vmem [shape: f32[32,4], index: 4, kind: input, shape index: {}]   ;;  %s3565_s5 = inlined_call_operand.vmem [shape: f32[1,4], index: 5, kind: input, shape index: {}]   ;;  %s3566_s6 = inlined_call_operand.vmem [shape: f32[1,4], index: 6, kind: input, shape index: {}]   ;;  %s3567_s7 = inlined_call_operand.vmem [shape: f32[2,128,8], index: 7, kind: input, shape index: {}]   ;;  %s3568_s8 = inlined_call_operand.vmem [shape: f32[2,128,16], index: 8, kind: output, shape index: {0}]   ;;  %s3569_s9 = inlined_call_operand.vmem [shape: f32[2,128,16], index: 9, kind: output, shape index: {1}]   ;;  %s3570_s10 = inlined_call_operand.vmem [shape: f32[2,128,4], index: 10, kind: output, shape index: {2}]   ;;  %s3571_s11 = inlined_call_operand.vmem [shape: f32[2,128,4], index: 11, kind: output, shape index: {3}]  }
   0x1 LB: > { %s1986_s18 = sadd.s32 4294967295, %s2138_s17   ;;  %p1990_p0 = scmp.ge.s32.totalorder %s2138_s17, 1  ;;  %s2138_s17 = sphi %s2205_s17, %s22_s17  }
   0x2   : > { %p344_p1 = scmp.lt.s32.totalorder %s2138_s17, 3 }
   0x4   : > { %p345_p2 = pnand %p1990_p0, %p344_p1 }
   0x6   : > { %348 = sbr.rel (%p345_p2) target bundleno = 803 (0x323), region = 52 }
   0xb   : > { %v2216_v0 = vld [vmem:[%s3567_s7 + $0x20] sm:$0xff]  ;;  %v2221_v1 = vld [vmem:[%s3567_s7 + $0x10] sm:$0xff]  ;;  %p399_p3 = scmp.lt.s32.totalorder %s1986_s18, 1  ;;  %s2140_s25 = smov 8   ;;  %v443_v3 = vld [vmem:[%s3561_s1 + $0x18] sm:$0xff]  ;;  %vm448_vm0 = vcmask 261120  }
   0xc   : > { %v2226_v2 = vld [vmem:[%s3567_s7] sm:$0xff]  ;;  %635 = vrot.lane.b32.xlu2 %v2216_v0, %s2140_s25  ;;  %631 = vrot.lane.b32.xlu1 %v2221_v1, %s2140_s25  ;;  %v442_v4 = vld [vmem:[%s3561_s1 + $0x10] sm:$0xff]  ;;  %s2141_s16 = smov 16   ;;  %s2142_s22 = smov 120   ;;  %vm947_vm1 = vcmask 64512   ;;  %vm1540_vm2 = vcmask 130048  }
   0xd   : > { %627 = vrot.lane.b32.xlu0 %v2226_v2, %s2140_s25  ;;  %509 = vmatpush.msra.mxu0 %v443_v3  ;;  %s3610_s18 = smov (!%p399_p3, %s1986_s18), 1  ;;  %v441_v5 = vld [vmem:[%s3561_s1 + $0x8] sm:$0xff]  ;;  %v440_v6 = vld [vmem:[%s3561_s1] sm:$0xff]  ;;  %v2264_v10 = vld [vmem:[%s3567_s7 + $0x18] sm:$0xff]  ;;  %s2143_s23 = smov 24   ;;  %vm1710_vm3 = vcmask 31744  }
   0xe   : > { %2072 = vmatpush.msra.mxu3 %v443_v3  ;;  %s2243_s13 = sshll.u32 %s3610_s18, 7  ;;  %v2259_v9 = vld [vmem:[%s3567_s7 + $0x28] sm:$0xff]  ;;  %v2284_v14 = vld [vmem:[%s3567_s7 + $0x40] sm:$0xff]  ;;  %v2289_v15 = vld [vmem:[%s3567_s7 + $0x38] sm:$0xff] }
   0xf   : > { %510 = vmatpush.msra.mxu0 %v442_v4  ;;  %s2252_s20 = scalar_lea.vmem %s3560_s0, %s2243_s13  ;;  %v2269_v11 = vld [vmem:[%s3567_s7 + $0x8] sm:$0xff]  ;;  %v2294_v16 = vld [vmem:[%s3567_s7 + $0x30] sm:$0xff]  ;;  %v2309_v19 = vld [vmem:[%s3567_s7 + $0x58] sm:$0xff]  ;;  %s2857_s27 = scalar_lea.vmem %s3568_s8, %s2243_s13 }
  0x10   : > { %2073 = vmatpush.msra.mxu3 %v442_v4  ;;  %v424_v7 = vld [vmem:[%s2252_s20] sm:$0xff]  ;;  %v425_v12 = vld [vmem:[%s2252_s20 + $0x8] sm:$0xff]  ;;  %v426_v17 = vld [vmem:[%s2252_s20 + $0x10] sm:$0xff]  ;;  %s2876_s12 = scalar_lea.vmem %s3570_s10, %s2243_s13  ;;  %s2905_s21 = scalar_lea.vmem %s3571_s11, %s2243_s13 }
  0x11   : > { %511 = vmatpush.msra.mxu0 %v441_v5  ;;  %v436_v8 = vld [vmem:[%s2252_s20 + $0x60] sm:$0xff]  ;;  %v437_v13 = vld [vmem:[%s2252_s20 + $0x68] sm:$0xff]  ;;  %v438_v18 = vld [vmem:[%s2252_s20 + $0x70] sm:$0xff]  ;;  %s3507_s14 = scalar_lea.vmem %s3569_s9, %s2243_s13 }
  0x12   : > { %2074 = vmatpush.msra.mxu3 %v441_v5  ;;  %v2314_v20 = vld [vmem:[%s3567_s7 + $0x50] sm:$0xff]  ;;  %v2319_v21 = vld [vmem:[%s3567_s7 + $0x48] sm:$0xff]  ;;  %v427_v22 = vld [vmem:[%s2252_s20 + $0x18] sm:$0xff] }
  0x13   : > { %512 = vmatpush.msra.mxu0 %v440_v6  ;;  %v439_v23 = vld [vmem:[%s2252_s20 + $0x78] sm:$0xff]  ;;  %v2334_v24 = vld [vmem:[%s3567_s7 + $0x70] sm:$0xff]  ;;  %v2339_v25 = vld [vmem:[%s3567_s7 + $0x68] sm:$0xff] }
  0x14   : > { %2075 = vmatpush.msra.mxu3 %v440_v6  ;;  %2001 = vmatmul.msk.f32.vlgmr.msra.gmra.mxu0 %vm448_vm0, %v424_v7  ;;  %v2344_v26 = vld [vmem:[%s3567_s7 + $0x60] sm:$0xff]  ;;  %v2363_v29 = vld [vmem:[%s3567_s7 + $0x90] sm:$0xff]  ;;  %v2368_v30 = vld [vmem:[%s3567_s7 + $0x78] sm:$0xff] }
  0x15   : > { %2013 = vmatmul.msk.f32.vlgmr.msra.gmra.mxu3 %vm448_vm0, %v436_v8  ;;  %637 = vrot.lane.b32.xlu2 %v2259_v9, %s2140_s25  ;;  %v428_v27 = vld [vmem:[%s2252_s20 + $0x20] sm:$0xff]  ;;  %v429_v31 = vld [vmem:[%s2252_s20 + $0x28] sm:$0xff]  ;;  %v2381_v32 = vld [vmem:[%s3567_s7 + $0x98] sm:$0xff] }
  0x16   : > { %633 = vrot.lane.b32.xlu1 %v2264_v10, %s2140_s25  ;;  %629 = vrot.lane.b32.xlu0 %v2269_v11, %s2140_s25  ;;  %v2358_v28 = vld [vmem:[%s3567_s7 + $0x80] sm:$0xff]  ;;  %v2386_v33 = vld [vmem:[%s3567_s7 + $0xa8] sm:$0xff] }
  0x17   : > { %v2391_v34 = vld [vmem:[%s3567_s7 + $0x88] sm:$0xff]  ;;  %v430_v35 = vld [vmem:[%s2252_s20 + $0x30] sm:$0xff]  ;;  %v2409_v37 = vld [vmem:[%s3567_s7 + $0xc0] sm:$0xff] }
  0x18   : > { %v2404_v36 = vld [vmem:[%s3567_s7 + $0xb0] sm:$0xff]  ;;  %3574 = vst [vmem:[#allocation2_spill] sm:$0xff] %v2409_v37  ;;  %v2414_v38 = vld [vmem:[%s3567_s7 + $0xa0] sm:$0xff]  ;;  %v431_v39 = vld [vmem:[%s2252_s20 + $0x38] sm:$0xff] }
  0x19   : > { %v2026_v40 = vld [vmem:[%s3567_s7 + $0xc8] sm:$0xff]  ;;  %v2430_v41 = vld [vmem:[%s3567_s7 + $0xd8] sm:$0xff]  ;;  %v432_v43 = vld [vmem:[%s2252_s20 + $0x40] sm:$0xff] }
  0x1a   : > { %v2435_v42 = vld [vmem:[%s3567_s7 + $0xb8] sm:$0xff]  ;;  %v2447_v44 = vld [vmem:[%s3567_s7 + $0xe0] sm:$0xff]  ;;  %v2452_v45 = vld [vmem:[%s3567_s7 + $0xf0] sm:$0xff] }
  0x1b   : > { %3575 = vst [vmem:[#allocation3_spill] sm:$0xff] %v2435_v42  ;;  %v2027_v46 = vld [vmem:[%s3567_s7 + $0xd0] sm:$0xff]  ;;  %v433_v47 = vld [vmem:[%s2252_s20 + $0x48] sm:$0xff]  ;;  %v2467_v48 = vld [vmem:[%s3567_s7 + $0xf8] sm:$0xff] }
  0x1c   : > { %2002 = vmatmul.msk.f32.gmra.mxu0 %vm448_vm0, %v425_v12  ;;  %v2472_v49 = vld [vmem:[%s3567_s7 + $0xe8] sm:$0xff]  ;;  %v434_v50 = vld [vmem:[%s2252_s20 + $0x50] sm:$0xff]  ;;  %v1576_v52 = vld [vmem:[%s3563_s3 + $0x18] sm:$0xff] }
  0x1d   : > { %2014 = vmatmul.msk.f32.gmra.mxu3 %vm448_vm0, %v437_v13  ;;  %643 = vrot.lane.b32.xlu2 %v2284_v14, %s2140_s25  ;;  %v1730_v53 = vld [vmem:[%s3564_s4 + $0x18] sm:$0xff]  ;;  %v1575_v54 = vld [vmem:[%s3563_s3 + $0x10] sm:$0xff]  ;;  %v1574_v58 = vld [vmem:[%s3563_s3 + $0x8] sm:$0xff] }
  0x1e   : > { %641 = vrot.lane.b32.xlu1 %v2289_v15, %s2140_s25  ;;  %639 = vrot.lane.b32.xlu0 %v2294_v16, %s2140_s25  ;;  %v435_v55 = vld [vmem:[%s2252_s20 + $0x58] sm:$0xff]  ;;  %v1729_v56 = vld [vmem:[%s3564_s4 + $0x10] sm:$0xff] }
  0x1f   : > { %1641 = vmatpush.msra.mxu1 %v1576_v52  ;;  %1747 = vmatpush.msra.mxu2 %v1730_v53  ;;  %v1728_v59 = vld [vmem:[%s3564_s4 + $0x8] sm:$0xff]  ;;  %v1573_v60 = vld [vmem:[%s3563_s3] sm:$0xff] }
  0x20   : > { %2076 = vmatpush.msrb.mxu3 %v1576_v52  ;;  %v1727_v61 = vld [vmem:[%s3564_s4] sm:$0xff] }
  0x21   : > { %1642 = vmatpush.msra.mxu1 %v1575_v54  ;;  %1748 = vmatpush.msra.mxu2 %v1729_v56  ;;  %v2548_v8 = vld [vmem:[%s3562_s2] ss:$0 sm:$0xff] }
  0x22   : > { %2077 = vmatpush.msrb.mxu3 %v1575_v54 }
  0x23   : > { %1643 = vmatpush.msra.mxu1 %v1574_v58  ;;  %1749 = vmatpush.msra.mxu2 %v1728_v59 }
  0x24   : > { %2003 = vmatmul.msk.f32.gmra.mxu0 %vm448_vm0, %v426_v17  ;;  %2078 = vmatpush.msrb.mxu3 %v1574_v58 }
  0x25   : > { %2015 = vmatmul.msk.f32.gmra.mxu3 %vm448_vm0, %v438_v18  ;;  %649 = vrot.lane.b32.xlu2 %v2309_v19, %s2140_s25 }
  0x26   : > { %647 = vrot.lane.b32.xlu1 %v2314_v20, %s2140_s25  ;;  %645 = vrot.lane.b32.xlu0 %v2319_v21, %s2140_s25 }
  0x27   : > { %1644 = vmatpush.msra.mxu1 %v1573_v60  ;;  %1750 = vmatpush.msra.mxu2 %v1727_v61 }
  0x28   : > { %2079 = vmatpush.msrb.mxu3 %v1573_v60 }
  0x2a   : > { %2080 = vmatpush.msra.mxu3 %v1730_v53 }
  0x2c   : > { %2004 = vmatmul.msk.f32.gmra.mxu0 %vm448_vm0, %v427_v22  ;;  %2081 = vmatpush.msra.mxu3 %v1729_v56 }
  0x2d   : > { %2016 = vmatmul.msk.f32.gmra.mxu3 %vm448_vm0, %v439_v23  ;;  %655 = vrot.lane.b32.xlu2 %v2334_v24, %s2140_s25 }
  0x2e   : > { %653 = vrot.lane.b32.xlu1 %v2339_v25, %s2140_s25  ;;  %651 = vrot.lane.b32.xlu0 %v2344_v26, %s2140_s25 }
  0x2f   : > { %2082 = vmatpush.msra.mxu3 %v1728_v59 }
  0x31   : > { %2083 = vmatpush.msra.mxu3 %v1727_v61 }
  0x34   : > { %2005 = vmatmul.msk.f32.gmra.mxu0 %vm448_vm0, %v428_v27 }
  0x35   : > { %787 = vrot.lane.b32.xlu2 %v2358_v28, %s2140_s25 }
  0x36   : > { %791 = vrot.lane.b32.xlu1 %v2363_v29, %s2140_s25  ;;  %657 = vrot.lane.b32.xlu0 %v2368_v30, %s2140_s25 }
  0x3c   : > { %2006 = vmatmul.msk.f32.gmra.mxu0 %vm448_vm0, %v429_v31 }
  0x3d   : > { %793 = vrot.lane.b32.xlu2 %v2381_v32, %s2140_s25 }
  0x3e   : > { %797 = vrot.lane.b32.xlu1 %v2386_v33, %s2140_s25  ;;  %789 = vrot.lane.b32.xlu0 %v2391_v34, %s2140_s25 }
  0x44   : > { %2007 = vmatmul.msk.f32.gmra.mxu0 %vm448_vm0, %v430_v35 }
  0x45   : > { %799 = vrot.lane.b32.xlu2 %v2404_v36, %s2140_s25 }
  0x46   : > { %803 = vrot.lane.b32.xlu1 %v2409_v37, %s2140_s25  ;;  %795 = vrot.lane.b32.xlu0 %v2414_v38, %s2140_s25 }
  0x4c   : > { %2008 = vmatmul.msk.f32.gmra.mxu0 %vm448_vm0, %v431_v39 }
  0x4d   : > { %805 = vrot.lane.b32.xlu2 %v2026_v40, %s2140_s25 }
  0x4e   : > { %809 = vrot.lane.b32.xlu1 %v2430_v41, %s2140_s25  ;;  %801 = vrot.lane.b32.xlu0 %v2435_v42, %s2140_s25 }
  0x54   : > { %2009 = vmatmul.msk.f32.gmra.mxu0 %vm448_vm0, %v432_v43 }
  0x55   : > { %811 = vrot.lane.b32.xlu2 %v2447_v44, %s2140_s25 }
  0x56   : > { %815 = vrot.lane.b32.xlu1 %v2452_v45, %s2140_s25  ;;  %807 = vrot.lane.b32.xlu0 %v2027_v46, %s2140_s25 }
  0x5c   : > { %2010 = vmatmul.msk.f32.gmra.mxu0 %vm448_vm0, %v433_v47 }
  0x5d   : > { %817 = vrot.lane.b32.xlu2 %v2467_v48, %s2140_s25 }
  0x5e   : > { %964 = vrot.lane.b32.xlu1 %v2358_v28, %s2141_s16  ;;  %813 = vrot.lane.b32.xlu0 %v2472_v49, %s2140_s25 }
  0x64   : > { %2011 = vmatmul.msk.f32.gmra.mxu0 %vm448_vm0, %v434_v50 }
  0x65   : > { %966 = vrot.lane.b32.xlu2 %v2391_v34, %s2141_s16 }
  0x66   : > { %970 = vrot.lane.b32.xlu1 %v2381_v32, %s2141_s16  ;;  %968 = vrot.lane.b32.xlu0 %v2363_v29, %s2141_s16  ;;  %v2489_v51 = vpop.permute.xlu2 %635 }
  0x6c   : > { %2012 = vmatmul.msk.f32.gmra.mxu0 %vm448_vm0, %v435_v55 }
  0x6d   : > { %972 = vrot.lane.b32.xlu2 %v2414_v38, %s2141_s16 }
  0x6e   : > { %976 = vrot.lane.b32.xlu1 %v2404_v36, %s2141_s16  ;;  %974 = vrot.lane.b32.xlu0 %v2386_v33, %s2141_s16 }
  0x6f   : > { %v2511_v57 = vpop.permute.xlu2 %637 }
  0x75   : > { %978 = vrot.lane.b32.xlu2 %v2435_v42, %s2141_s16 }
  0x76   : > { %982 = vrot.lane.b32.xlu1 %v2026_v40, %s2141_s16  ;;  %980 = vrot.lane.b32.xlu0 %v2409_v37, %s2141_s16 }
  0x77   : > { %v2530_v62 = vpop.permute.xlu2 %643 }
  0x7d   : > { %984 = vrot.lane.b32.xlu2 %v2027_v46, %s2141_s16 }
  0x7e   : > { %988 = vrot.lane.b32.xlu1 %v2447_v44, %s2141_s16  ;;  %986 = vrot.lane.b32.xlu0 %v2430_v41, %s2141_s16  ;;  %v632_v63 = vpop.permute.xlu1 %631 }
  0x7f   : > { %v2537_v3 = vpop.permute.xlu2 %649  ;;  %v628_v4 = vpop.permute.xlu0 %627 }
  0x85   : > { %990 = vrot.lane.b32.xlu2 %v2472_v49, %s2141_s16 }
  0x86   : > { %992 = vrot.lane.b32.xlu0 %v2452_v45, %s2141_s16 }
  0x87   : > { %v656_v5 = vpop.permute.xlu2 %655 }
  0x88   : > { %v2543_v6 = vpop.permute.xlu1 %633  ;;  %v630_v7 = vpop.permute.xlu0 %629 }
  0x8f   : > { %v2550_v12 = vpop.permute.xlu2 %787 }
  0x90   : > { %v2552_v13 = vpop.permute.xlu1 %641  ;;  %v2554_v17 = vpop.permute.xlu0 %639 }
  0x91   : > { %v514_v18 = vpop.f32.mrf.mxu0 }
  0x92   : > { %v2557_v22 = vadd.f32 %v2548_v8, %v514_v18 }
  0x94   : > { %2033 = vmatmul.msk.f32.vlgmr.msra.gmra.mxu1 %vm448_vm0, %v2557_v22  ;;  %2049 = vmatmul.msk.f32.vlgmr.msra.gmra.mxu2 %vm448_vm0, %v2557_v22  ;;  %v851_v23 = vmul.f32 %v2226_v2, %v2557_v22  ;;  %v675_v27 = vmul.f32 %v628_v4, %v2557_v22 }
  0x96   : > { %883 = vrot.lane.b32.xlu0 %v851_v23, %s2140_s25  ;;  %707 = vrot.lane.b32.xlu1 %v675_v27, %s2142_s22 }
  0x97   : > { %v2568_v31 = vpop.permute.xlu2 %793 }
  0x98   : > { %v2570_v35 = vpop.permute.xlu1 %647  ;;  %v2572_v39 = vpop.permute.xlu0 %645 }
  0x99   : > { %v550_v40 = vpop.f32.mrf.mxu3  ;;  %v517_v41 = vpop.f32.mrf.mxu0 }
  0x9a   : > { %v2575_v43 = vadd.f32 %v2548_v8, %v550_v40  ;;  %v2578_v46 = vadd.f32 %v2548_v8, %v517_v41 }
  0x9c   : > { %2045 = vmatmul.msk.f32.vlgmr.msrb.gmra.mxu3 %vm448_vm0, %v2575_v43  ;;  %2034 = vmatmul.msk.f32.gmra.mxu1 %vm448_vm0, %v2578_v46  ;;  %v676_v47 = vmul.f32 %v630_v7, %v2578_v46  ;;  %v863_v50 = vmul.f32 %v2344_v26, %v2575_v43  ;;  %v852_v40 = vmul.f32 %v2269_v11, %v2578_v46 }
  0x9d   : > { %2050 = vmatmul.msk.f32.gmra.mxu2 %vm448_vm0, %v2578_v46 }
  0x9e   : > { %709 = vrot.lane.b32.xlu2 %v676_v47, %s2142_s22  ;;  %907 = vrot.lane.b32.xlu0 %v863_v50, %s2140_s25 }
  0x9f   : > { %v2591_v52 = vpop.permute.xlu2 %799 }
  0xa0   : > { %v654_v53 = vpop.permute.xlu1 %653  ;;  %v652_v54 = vpop.permute.xlu0 %651 }
  0xa1   : > { %v687_v55 = vmul.f32 %v652_v54, %v2575_v43  ;;  %v553_v56 = vpop.f32.mrf.mxu3  ;;  %v520_v58 = vpop.f32.mrf.mxu0 }
  0xa2   : > { %v2595_v59 = vadd.f32 %v2548_v8, %v553_v56  ;;  %v2598_v60 = vadd.f32 %v2548_v8, %v520_v58 }
  0xa3   : > { %731 = vrot.lane.b32.xlu1 %v687_v55, %s2142_s22 }
  0xa4   : > { %2046 = vmatmul.msk.f32.gmra.mxu3 %vm448_vm0, %v2595_v59  ;;  %2035 = vmatmul.msk.f32.gmra.mxu1 %vm448_vm0, %v2598_v60  ;;  %v688_v61 = vmul.f32 %v654_v53, %v2595_v59  ;;  %v677_v4 = vmul.f32 %v632_v63, %v2598_v60  ;;  %v853_v50 = vmul.f32 %v2221_v1, %v2598_v60 }
  0xa5   : > { %2051 = vmatmul.msk.f32.gmra.mxu2 %vm448_vm0, %v2598_v60 }
  0xa6   : > { %733 = vrot.lane.b32.xlu2 %v688_v61, %s2142_s22  ;;  %711 = vrot.lane.b32.xlu0 %v677_v4, %s2142_s22  ;;  %v864_v61 = vmul.f32 %v2339_v25, %v2595_v59 }
  0xa7   : > { %v2615_v41 = vpop.permute.xlu2 %805 }
  0xa8   : > { %v2611_v7 = vpop.permute.xlu1 %791  ;;  %v658_v18 = vpop.permute.xlu0 %657  ;;  %3576 = vst [vmem:[#allocation4_spill] sm:$0xff] %v2615_v41 }
  0xa9   : > { %v556_v23 = vpop.f32.mrf.mxu3  ;;  %v523_v27 = vpop.f32.mrf.mxu0 }
  0xaa   : > { %v2618_v47 = vadd.f32 %v2548_v8, %v556_v23  ;;  %v2621_v63 = vadd.f32 %v2548_v8, %v523_v27 }
  0xab   : > { %885 = vrot.lane.b32.xlu1 %v852_v40, %s2140_s25 }
  0xac   : > { %2047 = vmatmul.msk.f32.gmra.mxu3 %vm448_vm0, %v2618_v47  ;;  %v689_v53 = vmul.f32 %v656_v5, %v2618_v47  ;;  %2036 = vmatmul.msk.f32.gmra.mxu1 %vm448_vm0, %v2621_v63  ;;  %v854_v23 = vmul.f32 %v2264_v10, %v2621_v63  ;;  %v865_v40 = vmul.f32 %v2334_v24, %v2618_v47 }
  0xad   : > { %2052 = vmatmul.msk.f32.gmra.mxu2 %vm448_vm0, %v2621_v63 }
  0xae   : > { %887 = vrot.lane.b32.xlu2 %v853_v50, %s2140_s25  ;;  %735 = vrot.lane.b32.xlu0 %v689_v53, %s2142_s22 }
  0xaf   : > { %v2650_v27 = vpop.permute.xlu2 %811 }
  0xb0   : > { %v2635_v54 = vpop.permute.xlu1 %797  ;;  %v2637_v55 = vpop.permute.xlu0 %789 }
  0xb1   : > { %v559_v56 = vpop.f32.mrf.mxu3  ;;  %v526_v58 = vpop.f32.mrf.mxu0 }
  0xb2   : > { %v2642_v5 = vadd.f32 %v2548_v8, %v559_v56  ;;  %v2645_v4 = vadd.f32 %v2548_v8, %v526_v58  ;;  %v678_v56 = vmul.f32 %v2543_v6, %v2621_v63 }
  0xb3   : > { %909 = vrot.lane.b32.xlu1 %v864_v61, %s2140_s25 }
  0xb4   : > { %2048 = vmatmul.msk.f32.gmra.mxu3 %vm448_vm0, %v2642_v5  ;;  %2037 = vmatmul.msk.f32.gmra.mxu1 %vm448_vm0, %v2645_v4  ;;  %v866_v61 = vmul.f32 %v2368_v30, %v2642_v5 }
  0xb5   : > { %2053 = vmatmul.msk.f32.gmra.mxu2 %vm448_vm0, %v2645_v4 }
  0xb6   : > { %911 = vrot.lane.b32.xlu2 %v865_v40, %s2140_s25  ;;  %889 = vrot.lane.b32.xlu0 %v854_v23, %s2140_s25  ;;  %v679_v23 = vmul.f32 %v2489_v51, %v2645_v4 }
  0xb7   : > { %v2682_v6 = vpop.permute.xlu2 %817 }
  0xb8   : > { %v2662_v50 = vpop.permute.xlu0 %795  ;;  %v2671_v41 = vpop.permute.xlu1 %803 }
  0xb9   : > { %v529_v53 = vpop.f32.mrf.mxu0 }
  0xba   : > { %v2667_v58 = vadd.f32 %v2548_v8, %v529_v53 }
  0xbb   : > { %713 = vrot.lane.b32.xlu1 %v678_v56, %s2142_s22  ;;  %v690_v56 = vmul.f32 %v658_v18, %v2642_v5 }
  0xbc   : > { %2061 = vmatmul.msk.f32.vlgmr.msra.gmra.mxu3 %vm448_vm0, %v2575_v43  ;;  %2038 = vmatmul.msk.f32.gmra.mxu1 %vm448_vm0, %v2667_v58  ;;  %v680_v51 = vmul.f32 %v2511_v57, %v2667_v58  ;;  %v855_v57 = vmul.f32 %v2216_v0, %v2645_v4 }
  0xbd   : > { %2054 = vmatmul.msk.f32.gmra.mxu2 %vm448_vm0, %v2667_v58 }
  0xbe   : > { %715 = vrot.lane.b32.xlu2 %v679_v23, %s2142_s22  ;;  %913 = vrot.lane.b32.xlu0 %v866_v61, %s2140_s25 }
  0xbf   : > { %v2706_v18 = vpop.permute.xlu2 %966 }
  0xc0   : > { %v2686_v40 = vpop.permute.xlu0 %801  ;;  %v2699_v61 = vpop.permute.xlu1 %809  ;;  %3579 = vst [vmem:[#allocation7_spill] sm:$0xff] %v2706_v18 }
  0xc1   : > { %3577 = vst [vmem:[#allocation5_spill] sm:$0xff] %v2686_v40  ;;  %v532_v53 = vpop.f32.mrf.mxu0 }
  0xc2   : > { %v2690_v42 = vadd.f32 %v2548_v8, %v532_v53  ;;  %3578 = vst [vmem:[#allocation6_spill] sm:$0xff] %v2699_v61 }
  0xc3   : > { %737 = vrot.lane.b32.xlu1 %v690_v56, %s2142_s22 }
  0xc4   : > { %2062 = vmatmul.msk.f32.gmra.mxu3 %vm448_vm0, %v2595_v59  ;;  %2039 = vmatmul.msk.f32.gmra.mxu1 %vm448_vm0, %v2690_v42  ;;  %v857_v61 = vmul.f32 %v2294_v16, %v2690_v42  ;;  %v681_v40 = vmul.f32 %v2554_v17, %v2690_v42 }
  0xc5   : > { %2055 = vmatmul.msk.f32.gmra.mxu2 %vm448_vm0, %v2690_v42 }
  0xc6   : > { %1028 = vrot.lane.b32.xlu2 %v2226_v2, %s2143_s23  ;;  %717 = vrot.lane.b32.xlu0 %v680_v51, %s2142_s22  ;;  %v856_v2 = vmul.f32 %v2259_v9, %v2667_v58 }
  0xc7   : > { %v2732_v18 = vpop.permute.xlu2 %972 }
  0xc8   : > { %v2708_v23 = vpop.permute.xlu0 %807  ;;  %v2728_v51 = vpop.permute.xlu1 %815  ;;  %3581 = vst [vmem:[#allocation9_spill] sm:$0xff] %v2732_v18 }
  0xc9   : > { %3580 = vst [vmem:[#allocation8_spill] sm:$0xff] %v2708_v23  ;;  %v535_v53 = vpop.f32.mrf.mxu0 }
  0xca   : > { %v2713_v56 = vadd.f32 %v2548_v8, %v535_v53 }
  0xcb   : > { %891 = vrot.lane.b32.xlu1 %v855_v57, %s2140_s25 }
  0xcc   : > { %2063 = vmatmul.msk.f32.gmra.mxu3 %vm448_vm0, %v2618_v47  ;;  %2040 = vmatmul.msk.f32.gmra.mxu1 %vm448_vm0, %v2713_v56  ;;  %v858_v17 = vmul.f32 %v2289_v15, %v2713_v56 }
  0xcd   : > { %2056 = vmatmul.msk.f32.gmra.mxu2 %vm448_vm0, %v2713_v56 }
  0xce   : > { %893 = vrot.lane.b32.xlu2 %v856_v2, %s2140_s25  ;;  %895 = vrot.lane.b32.xlu0 %v857_v61, %s2140_s25  ;;  %v682_v2 = vmul.f32 %v2552_v13, %v2713_v56 }
  0xcf   : > { %v2760_v37 = vpop.permute.xlu2 %978 }
  0xd0   : > { %v2730_v53 = vpop.permute.xlu0 %813  ;;  %3583 = vst [vmem:[#allocation11_spill] sm:$0xff] %v2760_v37 }
  0xd1   : > { %v538_v57 = vpop.f32.mrf.mxu0 }
  0xd2   : > { %v2735_v23 = vadd.f32 %v2548_v8, %v538_v57  ;;  %v2752_v57 = vpop.permute.xlu1 %964 }
  0xd3   : > { %994 = vrot.lane.b32.xlu1 %v2467_v48, %s2141_s16 }
  0xd4   : > { %2064 = vmatmul.msk.f32.gmra.mxu3 %vm448_vm0, %v2642_v5  ;;  %2041 = vmatmul.msk.f32.gmra.mxu1 %vm448_vm0, %v2735_v23 }
  0xd5   : > { %2057 = vmatmul.msk.f32.gmra.mxu2 %vm448_vm0, %v2735_v23 }
  0xd6   : > { %721 = vrot.lane.b32.xlu2 %v682_v2, %s2142_s22  ;;  %1030 = vrot.lane.b32.xlu0 %v2269_v11, %s2143_s23  ;;  %v683_v2 = vmul.f32 %v2530_v62, %v2735_v23 }
  0xd8   : > { %v2750_v61 = vpop.permute.xlu0 %968 }
  0xd9   : > { %3582 = vst [vmem:[#allocation10_spill] sm:$0xff] %v2750_v61  ;;  %v541_v18 = vpop.f32.mrf.mxu0 }
  0xda   : > { %v2757_v13 = vadd.f32 %v2548_v8, %v541_v18  ;;  %v2780_v37 = vpop.permute.xlu1 %970 }
  0xdb   : > { %719 = vrot.lane.b32.xlu1 %v681_v40, %s2142_s22 }
  0xdc   : > { %2042 = vmatmul.msk.f32.gmra.mxu1 %vm448_vm0, %v2757_v13  ;;  %v860_v62 = vmul.f32 %v2319_v21, %v2757_v13 }
  0xdd   : > { %2058 = vmatmul.msk.f32.gmra.mxu2 %vm448_vm0, %v2757_v13 }
  0xde   : > { %1034 = vrot.lane.b32.xlu2 %v2264_v10, %s2143_s23  ;;  %723 = vrot.lane.b32.xlu0 %v683_v2, %s2142_s22  ;;  %v859_v10 = vmul.f32 %v2284_v14, %v2735_v23  ;;  %v2789_v2 = vpop.permute.xlu2 %984 }
  0xdf   : > { %3585 = vst [vmem:[#allocation13_spill] sm:$0xff] %v2789_v2 }
  0xe0   : > { %v2773_v40 = vpop.permute.xlu0 %974 }
  0xe1   : > { %v544_v11 = vpop.f32.mrf.mxu0  ;;  %3584 = vst [vmem:[#allocation12_spill] sm:$0xff] %v2773_v40 }
  0xe2   : > { %v2776_v18 = vadd.f32 %v2548_v8, %v544_v11  ;;  %v2804_v2 = vpop.permute.xlu1 %976 }
  0xe3   : > { %897 = vrot.lane.b32.xlu1 %v858_v17, %s2140_s25 }
  0xe4   : > { %2043 = vmatmul.msk.f32.gmra.mxu1 %vm448_vm0, %v2776_v18  ;;  %v685_v61 = vmul.f32 %v2570_v35, %v2776_v18 }
  0xe5   : > { %2059 = vmatmul.msk.f32.gmra.mxu2 %vm448_vm0, %v2776_v18 }
  0xe6   : > { %899 = vrot.lane.b32.xlu2 %v859_v10, %s2140_s25  ;;  %901 = vrot.lane.b32.xlu0 %v860_v62, %s2140_s25  ;;  %v861_v10 = vmul.f32 %v2314_v20, %v2776_v18 }
  0xe8   : > { %v2798_v17 = vpop.permute.xlu0 %980 }
  0xe9   : > { %v547_v11 = vpop.f32.mrf.mxu0 }
  0xea   : > { %v2794_v40 = vadd.f32 %v2548_v8, %v547_v11  ;;  %v2811_v8 = vpop.permute.xlu2 %990 }
  0xeb   : > { %1032 = vrot.lane.b32.xlu1 %v2221_v1, %s2143_s23  ;;  %v684_v1 = vmul.f32 %v2572_v39, %v2757_v13 }
  0xec   : > { %2044 = vmatmul.msk.f32.gmra.mxu1 %vm448_vm0, %v2794_v40  ;;  %v686_v35 = vmul.f32 %v2537_v3, %v2794_v40  ;;  %v862_v39 = vmul.f32 %v2309_v19, %v2794_v40 }
  0xed   : > { %2060 = vmatmul.msk.f32.gmra.mxu2 %vm448_vm0, %v2794_v40 }
  0xee   : > { %727 = vrot.lane.b32.xlu2 %v685_v61, %s2142_s22  ;;  %1036 = vrot.lane.b32.xlu0 %v2216_v0, %s2143_s23  ;;  %v2823_v61 = vpop.permute.xlu1 %982 }
  0xf0   : > { %v2818_v62 = vpop.permute.xlu0 %986 }
  0xf1   : > { %3586 = vst [vmem:[#allocation14_spill] sm:$0xff] %v2818_v62 }
  0xf3   : > { %725 = vrot.lane.b32.xlu1 %v684_v1, %s2142_s22  ;;  %v835_v1 = vmul.f32 %v2550_v12, %v2557_v22 }
  0xf6   : > { %1040 = vrot.lane.b32.xlu2 %v2294_v16, %s2143_s23  ;;  %729 = vrot.lane.b32.xlu0 %v686_v35, %s2142_s22  ;;  %v2839_v11 = vpop.permute.xlu1 %988 }
  0xf7   : > { %3587 = vst [vmem:[#allocation15_spill] sm:$0xff] %v2839_v11 }
  0xf8   : > { %v2825_v0 = vpop.permute.xlu2 %709  ;;  %v2835_v16 = vpop.permute.xlu0 %992 }
  0xfb   : > { %903 = vrot.lane.b32.xlu1 %v861_v10, %s2140_s25  ;;  %v595_v10 = vmul.f32 %v2358_v28, %v2557_v22 }
  0xfe   : > { %905 = vrot.lane.b32.xlu2 %v862_v39, %s2140_s25  ;;  %1042 = vrot.lane.b32.xlu0 %v2289_v15, %s2143_s23 }
 0x100   : > { %v2837_v3 = vpop.permute.xlu2 %733 }
 0x103   : > { %1038 = vrot.lane.b32.xlu1 %v2259_v9, %s2143_s23 }
 0x106   : > { %1046 = vrot.lane.b32.xlu2 %v2319_v21, %s2143_s23  ;;  %1048 = vrot.lane.b32.xlu0 %v2314_v20, %s2143_s23 }
 0x108   : > { %v888_v15 = vpop.permute.xlu2 %887  ;;  %v884_v35 = vpop.permute.xlu0 %883 }
 0x109   : > { %v931_v39 = vadd.f32 %v884_v35, %v835_v1  ;;  %v708_v62 = vpop.permute.xlu1 %707  ;;  %v2887_v1 = vld [vmem:[%s3566_s6] ss:$0 sm:$0xff] }
 0x10a   : > { %v755_v11 = vsub.f32 %v595_v10, %v708_v62 }
 0x10b   : > { %1044 = vrot.lane.b32.xlu1 %v2284_v14, %s2143_s23  ;;  %v2867_v14 = vld [vmem:[%s3565_s5] ss:$0 sm:$0xff] }
 0x10c   : > { %v948_v9 = vsel %vm947_vm1, %v755_v11, %v931_v39  ;;  %v607_v11 = vmul.f32 %v2447_v44, %v2575_v43  ;;  %v597_v44 = vmul.f32 %v2363_v29, %v2598_v60 }
 0x10d   : > { %v1524_v20 = vmul.f32 0.25, %v948_v9 }
 0x10e   : > { %1052 = vrot.lane.b32.xlu2 %v2344_v26, %s2143_s23  ;;  %1054 = vrot.lane.b32.xlu0 %v2339_v25, %s2143_s23  ;;  %v847_v25 = vmul.f32 %v2650_v27, %v2575_v43 }
 0x10f   : > { %1541 = vst.msk [vmem:[%s2857_s27] sm:$0xff] %vm1540_vm2, %v1524_v20 }
 0x110   : > { %v912_v21 = vpop.permute.xlu2 %911  ;;  %v908_v28 = vpop.permute.xlu0 %907 }
 0x111   : > { %v1646_v12 = vpop.f32.mrf.mxu1  ;;  %v943_v10 = vadd.f32 %v908_v28, %v847_v25 }
 0x112   : > { %v1647_v62 = vadd.f32 %v2867_v14, %v1646_v12 }
 0x113   : > { %1050 = vrot.lane.b32.xlu1 %v2309_v19, %s2143_s23  ;;  %v837_v19 = vmul.f32 %v2611_v7, %v2598_v60 }
 0x114   : > { %v1694_v26 = vmul.f32 0.5, %v1647_v62 }
 0x115   : > { %v732_v35 = vpop.permute.xlu1 %731  ;;  %v933_v62 = vadd.f32 %v888_v15, %v837_v19  ;;  %v836_v15 = vmul.f32 %v2637_v55, %v2578_v46 }
 0x116   : > { %1711 = vst.msk [vmem:[%s2876_s12] sm:$0xff] %vm1710_vm3, %v1694_v26  ;;  %v767_v39 = vsub.f32 %v607_v11, %v732_v35  ;;  %1058 = vrot.lane.b32.xlu2 %v2368_v30, %s2143_s23  ;;  %v596_v35 = vmul.f32 %v2391_v34, %v2578_v46 }
 0x117   : > { %v1752_v27 = vpop.f32.mrf.mxu2 }
 0x118   : > { %v960_v9 = vsel %vm947_vm1, %v767_v39, %v943_v10  ;;  %v1753_v20 = vadd.f32 %v2887_v1, %v1752_v27  ;;  %v2899_v12 = vpop.permute.xlu2 %715  ;;  %v712_v28 = vpop.permute.xlu0 %711  ;;  %v756_v27 = vsub.f32 %v596_v35, %v2825_v0  ;;  %v609_v0 = vmul.f32 %v2452_v45, %v2618_v47 }
 0x119   : > { %v1536_v25 = vmul.f32 0.25, %v960_v9  ;;  %v757_v30 = vsub.f32 %v597_v44, %v712_v28  ;;  %v1649_v7 = vpop.f32.mrf.mxu1  ;;  %v848_v45 = vmul.f32 %v2730_v53, %v2595_v59 }
 0x11a   : > { %v1800_v29 = vmul.f32 0.5, %v1753_v20  ;;  %v1650_v26 = vadd.f32 %v2867_v14, %v1649_v7 }
 0x11b   : > { %1553 = vst.msk [vmem:[%s2857_s27 + $0x60] sm:$0xff] %vm1540_vm2, %v1536_v25  ;;  %v950_v11 = vsel %vm947_vm1, %v757_v30, %v933_v62  ;;  %1056 = vrot.lane.b32.xlu1 %v2334_v24, %s2143_s23  ;;  %v849_v24 = vmul.f32 %v2728_v51, %v2618_v47 }
 0x11c   : > { %1816 = vst.msk [vmem:[%s2905_s21] sm:$0xff] %vm1710_vm3, %v1800_v29  ;;  %v1526_v10 = vmul.f32 0.25, %v950_v11  ;;  %v1695_v39 = vmul.f32 0.5, %v1650_v26 }
 0x11d   : > { %v886_v19 = vpop.permute.xlu1 %885  ;;  %v945_v26 = vadd.f32 %v912_v21, %v849_v24 }
 0x11e   : > { %1543 = vst.msk [vmem:[%s2857_s27 + $0x10] sm:$0xff] %vm1540_vm2, %v1526_v10  ;;  %v932_v44 = vadd.f32 %v886_v19, %v836_v15  ;;  %v608_v10 = vmul.f32 %v2472_v49, %v2595_v59 }
 0x11f   : > { %1712 = vst.msk [vmem:[%s2876_s12 + $0x8] sm:$0xff] %vm1710_vm3, %v1695_v39  ;;  %v1682_v9 = vpop.f32.mrf.mxu3 }
 0x120   : > { %v949_v55 = vsel %vm947_vm1, %v756_v27, %v932_v44  ;;  %v1683_v34 = vadd.f32 %v2867_v14, %v1682_v9  ;;  %v1755_v20 = vpop.f32.mrf.mxu2  ;;  %v1029_v28 = vpop.permute.xlu2 %1028  ;;  %v768_v44 = vsub.f32 %v608_v10, %v2837_v3 }
 0x121   : > { %v1525_v62 = vmul.f32 0.25, %v949_v55  ;;  %v1756_v25 = vadd.f32 %v2887_v1, %v1755_v20  ;;  %v1076_v30 = vmul.f32 %v1029_v28, %v2557_v22  ;;  %v736_v7 = vpop.permute.xlu0 %735  ;;  %v1652_v29 = vpop.f32.mrf.mxu1 }
 0x122   : > { %v1706_v51 = vmul.f32 0.5, %v1683_v34  ;;  %v769_v11 = vsub.f32 %v609_v0, %v736_v7  ;;  %v1653_v15 = vadd.f32 %v2867_v14, %v1652_v29  ;;  %v838_v7 = vmul.f32 %v2568_v31, %v2621_v63 }
 0x123   : > { %1542 = vst.msk [vmem:[%s2857_s27 + $0x8] sm:$0xff] %vm1540_vm2, %v1525_v62  ;;  %v1801_v35 = vmul.f32 0.5, %v1756_v25  ;;  %1108 = vrot.lane.b32.xlu0 %v1076_v30, %s2142_s22  ;;  %v598_v29 = vmul.f32 %v2381_v32, %v2621_v63 }
 0x124   : > { %1723 = vst.msk [vmem:[%s2876_s12 + $0x60] sm:$0xff] %vm1710_vm3, %v1706_v51  ;;  %v962_v21 = vsel %vm947_vm1, %v769_v11, %v945_v26  ;;  %v1696_v39 = vmul.f32 0.5, %v1653_v15 }
 0x125   : > { %1817 = vst.msk [vmem:[%s2905_s21 + $0x8] sm:$0xff] %vm1710_vm3, %v1801_v35  ;;  %v1538_v19 = vmul.f32 0.25, %v962_v21  ;;  %v910_v27 = vpop.permute.xlu1 %909 }
 0x126   : > { %1713 = vst.msk [vmem:[%s2876_s12 + $0x10] sm:$0xff] %vm1710_vm3, %v1696_v39  ;;  %v944_v9 = vadd.f32 %v910_v27, %v848_v45 }
 0x127   : > { %1555 = vst.msk [vmem:[%s2857_s27 + $0x70] sm:$0xff] %vm1540_vm2, %v1538_v19  ;;  %v1685_v53 = vpop.f32.mrf.mxu3 }
 0x128   : > { %v961_v49 = vsel %vm947_vm1, %v768_v44, %v944_v9  ;;  %v1686_v24 = vadd.f32 %v2867_v14, %v1685_v53  ;;  %v1758_v55 = vpop.f32.mrf.mxu2  ;;  %v894_v34 = vpop.permute.xlu2 %893 }
 0x129   : > { %v1537_v20 = vmul.f32 0.25, %v961_v49  ;;  %v1759_v28 = vadd.f32 %v2887_v1, %v1758_v55  ;;  %v890_v0 = vpop.permute.xlu0 %889  ;;  %v1655_v3 = vpop.f32.mrf.mxu1  ;;  %v850_v49 = vmul.f32 %v2682_v6, %v2642_v5 }
 0x12a   : > { %v1707_v62 = vmul.f32 0.5, %v1686_v24  ;;  %v1656_v25 = vadd.f32 %v2867_v14, %v1655_v3  ;;  %v934_v11 = vadd.f32 %v890_v0, %v838_v7  ;;  %v610_v24 = vmul.f32 %v2467_v48, %v2642_v5 }
 0x12b   : > { %1554 = vst.msk [vmem:[%s2857_s27 + $0x68] sm:$0xff] %vm1540_vm2, %v1537_v20  ;;  %v1802_v30 = vmul.f32 0.5, %v1759_v28  ;;  %v600_v48 = vmul.f32 %v2386_v33, %v2667_v58 }
 0x12c   : > { %1724 = vst.msk [vmem:[%s2876_s12 + $0x68] sm:$0xff] %vm1710_vm3, %v1707_v62  ;;  %v1697_v26 = vmul.f32 0.5, %v1656_v25  ;;  %v840_v62 = vmul.f32 %v2635_v54, %v2667_v58 }
 0x12d   : > { %1818 = vst.msk [vmem:[%s2905_s21 + $0x10] sm:$0xff] %vm1710_vm3, %v1802_v30  ;;  %v714_v51 = vpop.permute.xlu1 %713 }
 0x12e   : > { %v758_v15 = vsub.f32 %v598_v29, %v714_v51  ;;  %1714 = vst.msk [vmem:[%s2876_s12 + $0x18] sm:$0xff] %vm1710_vm3, %v1697_v26 }
 0x12f   : > { %v1688_v35 = vpop.f32.mrf.mxu3 }
 0x130   : > { %v951_v45 = vsel %vm947_vm1, %v758_v15, %v934_v11  ;;  %v1689_v10 = vadd.f32 %v2867_v14, %v1688_v35  ;;  %v2968_v31 = vpop.permute.xlu2 %721  ;;  %v1761_v21 = vpop.f32.mrf.mxu2  ;;  %v936_v35 = vadd.f32 %v894_v34, %v840_v62 }
 0x131   : > { %v1527_v32 = vmul.f32 0.25, %v951_v45  ;;  %v914_v39 = vpop.permute.xlu0 %913  ;;  %v1762_v19 = vadd.f32 %v2887_v1, %v1761_v21  ;;  %v1658_v27 = vpop.f32.mrf.mxu1  ;;  %v839_v21 = vmul.f32 %v2662_v50, %v2645_v4 }
 0x132   : > { %v1708_v44 = vmul.f32 0.5, %v1689_v10  ;;  %v1659_v9 = vadd.f32 %v2867_v14, %v1658_v27  ;;  %v946_v28 = vadd.f32 %v914_v39, %v850_v49 }
 0x133   : > { %1544 = vst.msk [vmem:[%s2857_s27 + $0x18] sm:$0xff] %vm1540_vm2, %v1527_v32  ;;  %v1803_v53 = vmul.f32 0.5, %v1762_v19  ;;  %v599_v32 = vmul.f32 %v2414_v38, %v2645_v4 }
 0x134   : > { %1725 = vst.msk [vmem:[%s2876_s12 + $0x70] sm:$0xff] %vm1710_vm3, %v1708_v44  ;;  %v1698_v55 = vmul.f32 0.5, %v1659_v9 }
 0x135   : > { %v738_v20 = vpop.permute.xlu1 %737  ;;  %1819 = vst.msk [vmem:[%s2905_s21 + $0x18] sm:$0xff] %vm1710_vm3, %v1803_v53  ;;  %v759_v44 = vsub.f32 %v599_v32, %v2899_v12 }
 0x136   : > { %v770_v0 = vsub.f32 %v610_v24, %v738_v20  ;;  %1715 = vst.msk [vmem:[%s2876_s12 + $0x20] sm:$0xff] %vm1710_vm3, %v1698_v55 }
 0x137   : > { %v1691_v3 = vpop.f32.mrf.mxu3 }
 0x138   : > { %v963_v6 = vsel %vm947_vm1, %v770_v0, %v946_v28  ;;  %v1692_v25 = vadd.f32 %v2867_v14, %v1691_v3  ;;  %v1035_v30 = vpop.permute.xlu2 %1034  ;;  %v1764_v7 = vpop.f32.mrf.mxu2 }
 0x139   : > { %v1539_v29 = vmul.f32 0.25, %v963_v6  ;;  %v1079_v26 = vmul.f32 %v1035_v30, %v2621_v63  ;;  %v718_v51 = vpop.permute.xlu0 %717  ;;  %v1765_v11 = vadd.f32 %v2887_v1, %v1764_v7  ;;  %v1661_v15 = vpop.f32.mrf.mxu1 }
 0x13a   : > { %v1709_v54 = vmul.f32 0.5, %v1692_v25  ;;  %v760_v45 = vsub.f32 %v600_v48, %v718_v51  ;;  %v1662_v10 = vadd.f32 %v2867_v14, %v1661_v15 }
 0x13b   : > { %1556 = vst.msk [vmem:[%s2857_s27 + $0x78] sm:$0xff] %vm1540_vm2, %v1539_v29  ;;  %1114 = vrot.lane.b32.xlu0 %v1079_v26, %s2142_s22  ;;  %v1804_v33 = vmul.f32 0.5, %v1765_v11 }
 0x13c   : > { %1726 = vst.msk [vmem:[%s2876_s12 + $0x78] sm:$0xff] %vm1710_vm3, %v1709_v54  ;;  %v953_v34 = vsel %vm947_vm1, %v760_v45, %v936_v35  ;;  %v1699_v39 = vmul.f32 0.5, %v1662_v10  ;;  %v841_v10 = vmul.f32 %v2591_v52, %v2690_v42  ;;  %v843_v52 = vmul.f32 %v2671_v41, %v2735_v23 }
 0x13d   : > { %v1529_v19 = vmul.f32 0.25, %v953_v34  ;;  %v892_v27 = vpop.permute.xlu1 %891  ;;  %1820 = vst.msk [vmem:[%s2905_s21 + $0x20] sm:$0xff] %vm1710_vm3, %v1804_v33  ;;  %v601_v33 = vmul.f32 %v2404_v36, %v2690_v42  ;;  %v3588_v36 = vld [vmem:[#allocation2_spill] sm:$0xff] }
 0x13e   : > { %v935_v9 = vadd.f32 %v892_v27, %v839_v21  ;;  %1716 = vst.msk [vmem:[%s2876_s12 + $0x28] sm:$0xff] %vm1710_vm3, %v1699_v39 }
 0x13f   : > { %1546 = vst.msk [vmem:[%s2857_s27 + $0x28] sm:$0xff] %vm1540_vm2, %v1529_v19  ;;  %v1788_v50 = vpop.f32.mrf.mxu3 }
 0x140   : > { %v952_v38 = vsel %vm947_vm1, %v759_v44, %v935_v9  ;;  %v1789_v53 = vadd.f32 %v2887_v1, %v1788_v50  ;;  %v900_v49 = vpop.permute.xlu2 %899  ;;  %v1767_v24 = vpop.f32.mrf.mxu2  ;;  %v603_v50 = vmul.f32 %v3588_v36, %v2735_v23 }
 0x141   : > { %v1528_v55 = vmul.f32 0.25, %v952_v38  ;;  %v896_v20 = vpop.permute.xlu0 %895  ;;  %v1768_v28 = vadd.f32 %v2887_v1, %v1767_v24  ;;  %v1664_v12 = vpop.f32.mrf.mxu1 }
 0x142   : > { %v1812_v0 = vmul.f32 0.5, %v1789_v53  ;;  %v1665_v3 = vadd.f32 %v2867_v14, %v1664_v12  ;;  %v937_v34 = vadd.f32 %v896_v20, %v841_v10  ;;  %v939_v12 = vadd.f32 %v900_v49, %v843_v52  ;;  %v3590_v49 = vld [vmem:[#allocation5_spill] sm:$0xff] }
 0x143   : > { %1545 = vst.msk [vmem:[%s2857_s27 + $0x20] sm:$0xff] %vm1540_vm2, %v1528_v55  ;;  %v1805_v62 = vmul.f32 0.5, %v1768_v28 }
 0x144   : > { %1828 = vst.msk [vmem:[%s2905_s21 + $0x60] sm:$0xff] %vm1710_vm3, %v1812_v0  ;;  %v1700_v6 = vmul.f32 0.5, %v1665_v3 }
 0x145   : > { %v3018_v25 = vpop.permute.xlu1 %994  ;;  %1821 = vst.msk [vmem:[%s2905_s21 + $0x28] sm:$0xff] %vm1710_vm3, %v1805_v62 }
 0x146   : > { %1717 = vst.msk [vmem:[%s2876_s12 + $0x30] sm:$0xff] %vm1710_vm3, %v1700_v6  ;;  %v3589_v6 = vld [vmem:[#allocation3_spill] sm:$0xff] }
 0x147   : > { %v1791_v30 = vpop.f32.mrf.mxu3 }
 0x148   : > { %v1792_v48 = vadd.f32 %v2887_v1, %v1791_v30  ;;  %v3025_v7 = vpop.permute.xlu2 %727  ;;  %v1770_v29 = vpop.f32.mrf.mxu2  ;;  %v602_v30 = vmul.f32 %v3589_v6, %v2713_v56 }
 0x149   : > { %v1031_v26 = vpop.permute.xlu0 %1030  ;;  %v1771_v51 = vadd.f32 %v2887_v1, %v1770_v29  ;;  %v1667_v11 = vpop.f32.mrf.mxu1  ;;  %v842_v29 = vmul.f32 %v3590_v49, %v2713_v56 }
 0x14a   : > { %v1813_v15 = vmul.f32 0.5, %v1792_v48  ;;  %v1077_v35 = vmul.f32 %v1031_v26, %v2578_v46  ;;  %v1668_v54 = vadd.f32 %v2867_v14, %v1667_v11 }
 0x14b   : > { %v1806_v45 = vmul.f32 0.5, %v1771_v51 }
 0x14c   : > { %1829 = vst.msk [vmem:[%s2905_s21 + $0x68] sm:$0xff] %vm1710_vm3, %v1813_v15  ;;  %1110 = vrot.lane.b32.xlu1 %v1077_v35, %s2142_s22  ;;  %v1701_v21 = vmul.f32 0.5, %v1668_v54  ;;  %v762_v15 = vsub.f32 %v602_v30, %v2968_v31 }
 0x14d   : > { %v720_v32 = vpop.permute.xlu1 %719  ;;  %1822 = vst.msk [vmem:[%s2905_s21 + $0x30] sm:$0xff] %vm1710_vm3, %v1806_v45 }
 0x14e   : > { %v761_v39 = vsub.f32 %v601_v33, %v720_v32  ;;  %1718 = vst.msk [vmem:[%s2876_s12 + $0x38] sm:$0xff] %vm1710_vm3, %v1701_v21 }
 0x14f   : > { %v1794_v19 = vpop.f32.mrf.mxu3 }
 0x150   : > { %v954_v27 = vsel %vm947_vm1, %v761_v39, %v937_v34  ;;  %v1795_v44 = vadd.f32 %v2887_v1, %v1794_v19  ;;  %v1041_v9 = vpop.permute.xlu2 %1040  ;;  %v1773_v38 = vpop.f32.mrf.mxu2 }
 0x151   : > { %v1530_v53 = vmul.f32 0.25, %v954_v27  ;;  %v1082_v24 = vmul.f32 %v1041_v9, %v2690_v42  ;;  %v724_v55 = vpop.permute.xlu0 %723  ;;  %v1774_v20 = vadd.f32 %v2887_v1, %v1773_v38  ;;  %v1670_v28 = vpop.f32.mrf.mxu1 }
 0x152   : > { %v1814_v41 = vmul.f32 0.5, %v1795_v44  ;;  %v763_v0 = vsub.f32 %v603_v50, %v724_v55  ;;  %v1671_v3 = vadd.f32 %v2867_v14, %v1670_v28 }
 0x153   : > { %1547 = vst.msk [vmem:[%s2857_s27 + $0x30] sm:$0xff] %vm1540_vm2, %v1530_v53  ;;  %1120 = vrot.lane.b32.xlu0 %v1082_v24, %s2142_s22  ;;  %v1807_v62 = vmul.f32 0.5, %v1774_v20 }
 0x154   : > { %1830 = vst.msk [vmem:[%s2905_s21 + $0x70] sm:$0xff] %vm1710_vm3, %v1814_v41  ;;  %v956_v48 = vsel %vm947_vm1, %v763_v0, %v939_v12  ;;  %v1702_v26 = vmul.f32 0.5, %v1671_v3  ;;  %v3591_v0 = vld [vmem:[#allocation4_spill] sm:$0xff] }
 0x155   : > { %v1532_v51 = vmul.f32 0.25, %v956_v48  ;;  %v898_v11 = vpop.permute.xlu1 %897  ;;  %1823 = vst.msk [vmem:[%s2905_s21 + $0x38] sm:$0xff] %vm1710_vm3, %v1807_v62  ;;  %v844_v3 = vmul.f32 %v3591_v0, %v2757_v13  ;;  %v3092_v62 = vld [vmem:[%s3567_s7 + $0xc8] sm:$0xff] }
 0x156   : > { %v938_v35 = vadd.f32 %v898_v11, %v842_v29  ;;  %1719 = vst.msk [vmem:[%s2876_s12 + $0x40] sm:$0xff] %vm1710_vm3, %v1702_v26  ;;  %v604_v6 = vmul.f32 %v3092_v62, %v2757_v13  ;;  %v3592_v26 = vld [vmem:[#allocation6_spill] sm:$0xff] }
 0x157   : > { %1549 = vst.msk [vmem:[%s2857_s27 + $0x40] sm:$0xff] %vm1540_vm2, %v1532_v51  ;;  %v1797_v54 = vpop.f32.mrf.mxu3  ;;  %v846_v51 = vmul.f32 %v3592_v26, %v2794_v40 }
 0x158   : > { %v955_v45 = vsel %vm947_vm1, %v762_v15, %v938_v35  ;;  %v1798_v10 = vadd.f32 %v2887_v1, %v1797_v54  ;;  %v906_v33 = vpop.permute.xlu2 %905  ;;  %v1776_v21 = vpop.f32.mrf.mxu2  ;;  %v3106_v35 = vld [vmem:[%s3567_s7 + $0xd8] sm:$0xff] }
 0x159   : > { %v1531_v32 = vmul.f32 0.25, %v955_v45  ;;  %v902_v34 = vpop.permute.xlu0 %901  ;;  %v1777_v39 = vadd.f32 %v2887_v1, %v1776_v21  ;;  %v1673_v31 = vpop.f32.mrf.mxu1  ;;  %v606_v54 = vmul.f32 %v3106_v35, %v2794_v40 }
 0x15a   : > { %v1815_v19 = vmul.f32 0.5, %v1798_v10  ;;  %v1674_v52 = vadd.f32 %v2867_v14, %v1673_v31  ;;  %v940_v49 = vadd.f32 %v902_v34, %v844_v3  ;;  %v942_v31 = vadd.f32 %v906_v33, %v846_v51 }
 0x15b   : > { %1548 = vst.msk [vmem:[%s2857_s27 + $0x38] sm:$0xff] %vm1540_vm2, %v1531_v32  ;;  %v1808_v27 = vmul.f32 0.5, %v1777_v39 }
 0x15c   : > { %1831 = vst.msk [vmem:[%s2905_s21 + $0x78] sm:$0xff] %vm1710_vm3, %v1815_v19  ;;  %v1703_v44 = vmul.f32 0.5, %v1674_v52 }
 0x15d   : > { %v1033_v9 = vpop.permute.xlu1 %1032  ;;  %1824 = vst.msk [vmem:[%s2905_s21 + $0x40] sm:$0xff] %vm1710_vm3, %v1808_v27 }
 0x15e   : > { %v1078_v36 = vmul.f32 %v1033_v9, %v2598_v60  ;;  %1720 = vst.msk [vmem:[%s2876_s12 + $0x48] sm:$0xff] %vm1710_vm3, %v1703_v44  ;;  %v3119_v44 = vld [vmem:[%s3567_s7 + $0xd0] sm:$0xff] }
 0x15f   : > { %v605_v9 = vmul.f32 %v3119_v44, %v2776_v18 }
 0x160   : > { %1112 = vrot.lane.b32.xlu2 %v1078_v36, %s2142_s22  ;;  %v1047_v50 = vpop.permute.xlu2 %1046  ;;  %v1779_v38 = vpop.f32.mrf.mxu2  ;;  %v3593_v36 = vld [vmem:[#allocation8_spill] sm:$0xff] }
 0x161   : > { %v1085_v53 = vmul.f32 %v1047_v50, %v2757_v13  ;;  %v1037_v24 = vpop.permute.xlu0 %1036  ;;  %v1780_v55 = vadd.f32 %v2887_v1, %v1779_v38  ;;  %v1676_v20 = vpop.f32.mrf.mxu1  ;;  %v845_v50 = vmul.f32 %v3593_v36, %v2776_v18  ;;  %v2113_v36 = vld [vmem:[%s3567_s7 + $0xb8] sm:$0xff] }
 0x162   : > { %v1080_v28 = vmul.f32 %v1037_v24, %v2645_v4  ;;  %v1677_v12 = vadd.f32 %v2867_v14, %v1676_v20  ;;  %v765_v24 = vsub.f32 %v605_v9, %v3025_v7  ;;  %v2111_v9 = vld [vmem:[%s3567_s7 + $0xa0] sm:$0xff] }
 0x163   : > { %1126 = vrot.lane.b32.xlu0 %v1085_v53, %s2142_s22  ;;  %v1809_v41 = vmul.f32 0.5, %v1780_v55 }
 0x164   : > { %1116 = vrot.lane.b32.xlu1 %v1080_v28, %s2142_s22  ;;  %v1704_v30 = vmul.f32 0.5, %v1677_v12 }
 0x165   : > { %v726_v48 = vpop.permute.xlu1 %725  ;;  %1825 = vst.msk [vmem:[%s2905_s21 + $0x48] sm:$0xff] %vm1710_vm3, %v1809_v41 }
 0x166   : > { %v764_v29 = vsub.f32 %v604_v6, %v726_v48  ;;  %1721 = vst.msk [vmem:[%s2876_s12 + $0x50] sm:$0xff] %vm1710_vm3, %v1704_v30 }
 0x168   : > { %v957_v11 = vsel %vm947_vm1, %v764_v29, %v940_v49  ;;  %v1053_v15 = vpop.permute.xlu2 %1052  ;;  %v1782_v45 = vpop.f32.mrf.mxu2 }
 0x169   : > { %v1533_v10 = vmul.f32 0.25, %v957_v11  ;;  %v1088_v21 = vmul.f32 %v1053_v15, %v2575_v43  ;;  %v730_v32 = vpop.permute.xlu0 %729  ;;  %v1783_v34 = vadd.f32 %v2887_v1, %v1782_v45  ;;  %v1679_v39 = vpop.f32.mrf.mxu1  ;;  %v2104_v45 = vld [vmem:[%s3567_s7 + $0xa8] sm:$0xff] }
 0x16a   : > { %v766_v19 = vsub.f32 %v606_v54, %v730_v32  ;;  %v1680_v52 = vadd.f32 %v2867_v14, %v1679_v39  ;;  %v2105_v32 = vld [vmem:[%s3567_s7 + $0xc0] sm:$0xff] }
 0x16b   : > { %1550 = vst.msk [vmem:[%s2857_s27 + $0x48] sm:$0xff] %vm1540_vm2, %v1533_v10  ;;  %1132 = vrot.lane.b32.xlu0 %v1088_v21, %s2142_s22  ;;  %v1810_v27 = vmul.f32 0.5, %v1783_v34  ;;  %v2106_v34 = vld [vmem:[%s3567_s7 + $0x80] sm:$0xff] }
 0x16c   : > { %v959_v33 = vsel %vm947_vm1, %v766_v19, %v942_v31  ;;  %v1705_v38 = vmul.f32 0.5, %v1680_v52  ;;  %v2107_v19 = vld [vmem:[%s3567_s7 + $0x98] sm:$0xff]  ;;  %v2108_v52 = vld [vmem:[%s3567_s7 + $0x88] sm:$0xff] }
 0x16d   : > { %v1535_v14 = vmul.f32 0.25, %v959_v33  ;;  %v904_v53 = vpop.permute.xlu1 %903  ;;  %1826 = vst.msk [vmem:[%s2905_s21 + $0x50] sm:$0xff] %vm1710_vm3, %v1810_v27  ;;  %v2109_v27 = vld [vmem:[%s3567_s7 + $0xf0] sm:$0xff]  ;;  %v2112_v33 = vld [vmem:[%s3567_s7 + $0x8] sm:$0xff] }
 0x16e   : > { %v941_v55 = vadd.f32 %v904_v53, %v845_v50  ;;  %1722 = vst.msk [vmem:[%s2876_s12 + $0x58] sm:$0xff] %vm1710_vm3, %v1705_v38  ;;  %v2114_v50 = vld [vmem:[%s3567_s7 + $0x20] sm:$0xff]  ;;  %v2118_v53 = vld [vmem:[%s3567_s7 + $0xe8] sm:$0xff] }
 0x16f   : > { %1552 = vst.msk [vmem:[%s2857_s27 + $0x58] sm:$0xff] %vm1540_vm2, %v1535_v14  ;;  %v2115_v38 = vld [vmem:[%s3567_s7 + $0xe0] sm:$0xff]  ;;  %v2117_v14 = vld [vmem:[%s3567_s7 + $0xf8] sm:$0xff] }
 0x170   : > { %v958_v20 = vsel %vm947_vm1, %v765_v24, %v941_v55  ;;  %v1059_v28 = vpop.permute.xlu2 %1058  ;;  %v1785_v12 = vpop.f32.mrf.mxu2  ;;  %v2120_v24 = vld [vmem:[%s3567_s7 + $0x10] sm:$0xff] }
 0x171   : > { %v1534_v41 = vmul.f32 0.25, %v958_v20  ;;  %v1091_v0 = vmul.f32 %v1059_v28, %v2642_v5  ;;  %v1043_v3 = vpop.permute.xlu0 %1042  ;;  %v1786_v6 = vadd.f32 %v2887_v1, %v1785_v12  ;;  %v2103_v1 = vld [vmem:[%s3567_s7 + $0x90] sm:$0xff]  ;;  %v2121_v20 = vld [vmem:[%s3567_s7] sm:$0xff]  ;;  %v2122_v28 = vld [vmem:[%s3567_s7 + $0x68] sm:$0xff] }
 0x172   : > { %v1083_v30 = vmul.f32 %v1043_v3, %v2713_v56  ;;  %v2123_v12 = vld [vmem:[%s3567_s7 + $0x28] sm:$0xff] }
 0x173   : > { %1551 = vst.msk [vmem:[%s2857_s27 + $0x50] sm:$0xff] %vm1540_vm2, %v1534_v41  ;;  %1138 = vrot.lane.b32.xlu0 %v1091_v0, %s2142_s22  ;;  %v1811_v7 = vmul.f32 0.5, %v1786_v6  ;;  %v2124_v0 = vld [vmem:[%s3567_s7 + $0x18] sm:$0xff]  ;;  %v2125_v6 = vld [vmem:[%s3567_s7 + $0x40] sm:$0xff] }
 0x174   : > { %1122 = vrot.lane.b32.xlu1 %v1083_v30, %s2142_s22 }
 0x175   : > { %v1039_v48 = vpop.permute.xlu1 %1038  ;;  %1827 = vst.msk [vmem:[%s2905_s21 + $0x58] sm:$0xff] %vm1710_vm3, %v1811_v7  ;;  %v2126_v7 = vld [vmem:[%s3567_s7 + $0x30] sm:$0xff] }
 0x176   : > { %v1081_v49 = vmul.f32 %v1039_v48, %v2667_v58 }
 0x178   : > { %1118 = vrot.lane.b32.xlu2 %v1081_v49, %s2142_s22  ;;  %v2127_v49 = vld [vmem:[%s3567_s7 + $0x58] sm:$0xff] }
 0x179   : > { %v1049_v29 = vpop.permute.xlu0 %1048 }
 0x17a   : > { %v1086_v26 = vmul.f32 %v1049_v29, %v2776_v18 }
 0x17b   : > { %1176 = vrot.lane.b32.xlu0 %v2103_v1, %s2143_s23  ;;  %v2128_v1 = vld [vmem:[%s3567_s7 + $0x48] sm:$0xff] }
 0x17c   : > { %1128 = vrot.lane.b32.xlu1 %v1086_v26, %s2142_s22 }
 0x17d   : > { %v1045_v51 = vpop.permute.xlu1 %1044 }
 0x17e   : > { %v1084_v11 = vmul.f32 %v1045_v51, %v2735_v23 }
 0x180   : > { %1124 = vrot.lane.b32.xlu2 %v1084_v11, %s2142_s22  ;;  %v2129_v11 = vld [vmem:[%s3567_s7 + $0x70] sm:$0xff] }
 0x181   : > { %v1055_v15 = vpop.permute.xlu0 %1054 }
 0x182   : > { %v1089_v54 = vmul.f32 %v1055_v15, %v2595_v59 }
 0x183   : > { %1182 = vrot.lane.b32.xlu0 %v2104_v45, %s2143_s23  ;;  %v2130_v45 = vld [vmem:[%s3567_s7 + $0x60] sm:$0xff] }
 0x184   : > { %1134 = vrot.lane.b32.xlu1 %v1089_v54, %s2142_s22 }
 0x185   : > { %v1051_v10 = vpop.permute.xlu1 %1050 }
 0x186   : > { %v1087_v21 = vmul.f32 %v1051_v10, %v2794_v40 }
 0x188   : > { %1130 = vrot.lane.b32.xlu2 %v1087_v21, %s2142_s22  ;;  %v3297_v21 = vmul.f32 %v3018_v25, %v2642_v5 }
 0x18b   : > { %1188 = vrot.lane.b32.xlu0 %v2105_v32, %s2143_s23 }
 0x18c   : > { %1172 = vrot.lane.b32.xlu1 %v2106_v34, %s2143_s23 }
 0x18d   : > { %v1057_v39 = vpop.permute.xlu1 %1056 }
 0x18e   : > { %v1090_v31 = vmul.f32 %v1057_v39, %v2618_v47 }
 0x190   : > { %1136 = vrot.lane.b32.xlu2 %v1090_v31, %s2142_s22  ;;  %v2131_v31 = vld [vmem:[%s3567_s7 + $0x78] sm:$0xff] }
 0x193   : > { %1194 = vrot.lane.b32.xlu0 %v3106_v35, %s2143_s23  ;;  %v2110_v35 = vld [vmem:[%s3567_s7 + $0xb0] sm:$0xff] }
 0x194   : > { %1178 = vrot.lane.b32.xlu1 %v2107_v19, %s2143_s23  ;;  %v3311_v19 = vmul.f32 %v2835_v16, %v2618_v47 }
 0x195   : > { %v3233_v55 = vpop.permute.xlu0 %1108 }
 0x198   : > { %1174 = vrot.lane.b32.xlu2 %v2108_v52, %s2143_s23 }
 0x19b   : > { %1200 = vrot.lane.b32.xlu0 %v2109_v27, %s2143_s23 }
 0x19c   : > { %1184 = vrot.lane.b32.xlu1 %v2110_v35, %s2143_s23 }
 0x1a0   : > { %1180 = vrot.lane.b32.xlu2 %v2111_v9, %s2143_s23 }
 0x1a3   : > { %1238 = vrot.lane.b32.xlu0 %v2112_v33, %s2141_s16  ;;  %v3325_v33 = vmul.f32 %v2811_v8, %v2595_v59 }
 0x1a4   : > { %1190 = vrot.lane.b32.xlu1 %v3092_v62, %s2143_s23  ;;  %v2116_v62 = vld [vmem:[%s3567_s7 + $0x38] sm:$0xff] }
 0x1a8   : > { %1186 = vrot.lane.b32.xlu2 %v2113_v36, %s2143_s23 }
 0x1ab   : > { %1244 = vrot.lane.b32.xlu0 %v2114_v50, %s2141_s16 }
 0x1ac   : > { %1196 = vrot.lane.b32.xlu1 %v2115_v38, %s2143_s23 }
 0x1ad   : > { %v3247_v41 = vpop.permute.xlu0 %1114 }
 0x1b0   : > { %1192 = vrot.lane.b32.xlu2 %v3119_v44, %s2143_s23  ;;  %v2119_v44 = vld [vmem:[%s3567_s7 + $0x50] sm:$0xff] }
 0x1b3   : > { %1250 = vrot.lane.b32.xlu0 %v2116_v62, %s2141_s16 }
 0x1b4   : > { %1202 = vrot.lane.b32.xlu1 %v2117_v14, %s2143_s23 }
 0x1b8   : > { %1198 = vrot.lane.b32.xlu2 %v2118_v53, %s2143_s23 }
 0x1ba   : > { %v3253_v3 = vpop.permute.xlu2 %1112 }
 0x1bb   : > { %1256 = vrot.lane.b32.xlu0 %v2119_v44, %s2141_s16 }
 0x1bc   : > { %1240 = vrot.lane.b32.xlu1 %v2120_v24, %s2141_s16 }
 0x1be   : > { %v3273_v26 = vpop.permute.xlu1 %1110 }
 0x1c0   : > { %1236 = vrot.lane.b32.xlu2 %v2121_v20, %s2141_s16 }
 0x1c3   : > { %1262 = vrot.lane.b32.xlu0 %v2122_v28, %s2141_s16 }
 0x1c4   : > { %1246 = vrot.lane.b32.xlu1 %v2123_v12, %s2141_s16 }
 0x1c5   : > { %v3259_v30 = vpop.permute.xlu0 %1120 }
 0x1c8   : > { %1242 = vrot.lane.b32.xlu2 %v2124_v0, %s2141_s16 }
 0x1cc   : > { %1252 = vrot.lane.b32.xlu1 %v2125_v6, %s2141_s16 }
 0x1d0   : > { %1248 = vrot.lane.b32.xlu2 %v2126_v7, %s2141_s16 }
 0x1d2   : > { %v3265_v48 = vpop.permute.xlu2 %1118 }
 0x1d4   : > { %1258 = vrot.lane.b32.xlu1 %v2127_v49, %s2141_s16 }
 0x1d5   : > { %v3271_v29 = vpop.permute.xlu0 %1126 }
 0x1d6   : > { %v3287_v54 = vpop.permute.xlu1 %1116 }
 0x1d8   : > { %1254 = vrot.lane.b32.xlu2 %v2128_v1, %s2141_s16 }
 0x1da   : > { %v3279_v51 = vpop.permute.xlu2 %1124 }
 0x1dc   : > { %1264 = vrot.lane.b32.xlu1 %v2129_v11, %s2141_s16 }
 0x1dd   : > { %v3285_v15 = vpop.permute.xlu0 %1132 }
 0x1e0   : > { %1260 = vrot.lane.b32.xlu2 %v2130_v45, %s2141_s16 }
 0x1e2   : > { %v3293_v10 = vpop.permute.xlu2 %1130 }
 0x1e5   : > { %v3299_v32 = vpop.permute.xlu0 %1138 }
 0x1e6   : > { %v3303_v39 = vpop.permute.xlu1 %1122 }
 0x1e8   : > { %1266 = vrot.lane.b32.xlu2 %v2131_v31, %s2141_s16  ;;  %s2144_s16 = smov 112  }
 0x1ea   : > { %v3313_v52 = vpop.permute.xlu2 %1136 }
 0x1ed   : > { %v3317_v27 = vpop.permute.xlu0 %1176 }
 0x1ee   : > { %v3319_v35 = vpop.permute.xlu1 %1128 }
 0x1f2   : > { %v3321_v9 = vpop.permute.xlu2 %1174 }
 0x1f5   : > { %v3327_v36 = vpop.permute.xlu0 %1182 }
 0x1f6   : > { %v3329_v50 = vpop.permute.xlu1 %1134 }
 0x1fa   : > { %v3333_v38 = vpop.permute.xlu2 %1180 }
 0x1fd   : > { %v3335_v62 = vpop.permute.xlu0 %1188 }
 0x1fe   : > { %v3337_v14 = vpop.permute.xlu1 %1172 }
 0x202   : > { %v3339_v53 = vpop.permute.xlu2 %1186 }
 0x205   : > { %v3341_v44 = vpop.permute.xlu0 %1194 }
 0x206   : > { %v3343_v24 = vpop.permute.xlu1 %1178 }
 0x20a   : > { %v3345_v8 = vpop.permute.xlu2 %1192 }
 0x20d   : > { %v3347_v20 = vpop.permute.xlu0 %1200 }
 0x20e   : > { %v3349_v28 = vpop.permute.xlu1 %1184 }
 0x212   : > { %v3351_v12 = vpop.permute.xlu2 %1198 }
 0x215   : > { %v1239_v0 = vpop.permute.xlu0 %1238 }
 0x216   : > { %v1285_v6 = vmul.f32 %v1239_v0, %v2578_v46  ;;  %v3354_v7 = vpop.permute.xlu1 %1190 }
 0x218   : > { %1318 = vrot.lane.b32.xlu1 %v1285_v6, %s2140_s25 }
 0x21a   : > { %v1237_v49 = vpop.permute.xlu2 %1236 }
 0x21b   : > { %v1284_v1 = vmul.f32 %v1237_v49, %v2557_v22 }
 0x21d   : > { %1316 = vrot.lane.b32.xlu0 %v1284_v1, %s2140_s25  ;;  %v1245_v11 = vpop.permute.xlu0 %1244 }
 0x21e   : > { %v1288_v45 = vmul.f32 %v1245_v11, %v2645_v4  ;;  %v3360_v31 = vpop.permute.xlu1 %1196 }
 0x21f   : > { %3594 = vst [vmem:[#allocation2_spill] sm:$0xff] %v3360_v31 }
 0x220   : > { %1324 = vrot.lane.b32.xlu1 %v1288_v45, %s2140_s25 }
 0x222   : > { %v1243_v16 = vpop.permute.xlu2 %1242 }
 0x223   : > { %v1287_v25 = vmul.f32 %v1243_v16, %v2621_v63 }
 0x225   : > { %1322 = vrot.lane.b32.xlu0 %v1287_v25, %s2140_s25  ;;  %v1251_v0 = vpop.permute.xlu0 %1250 }
 0x226   : > { %v1291_v6 = vmul.f32 %v1251_v0, %v2713_v56  ;;  %v3366_v34 = vpop.permute.xlu1 %1202 }
 0x227   : > { %3595 = vst [vmem:[#allocation3_spill] sm:$0xff] %v3366_v34 }
 0x228   : > { %1330 = vrot.lane.b32.xlu1 %v1291_v6, %s2140_s25 }
 0x22a   : > { %v1249_v49 = vpop.permute.xlu2 %1248 }
 0x22b   : > { %v1290_v1 = vmul.f32 %v1249_v49, %v2690_v42 }
 0x22d   : > { %1328 = vrot.lane.b32.xlu0 %v1290_v1, %s2140_s25  ;;  %v1257_v11 = vpop.permute.xlu0 %1256 }
 0x22e   : > { %v1294_v45 = vmul.f32 %v1257_v11, %v2776_v18  ;;  %v1241_v31 = vpop.permute.xlu1 %1240 }
 0x22f   : > { %v1286_v16 = vmul.f32 %v1241_v31, %v2598_v60 }
 0x230   : > { %1336 = vrot.lane.b32.xlu1 %v1294_v45, %s2140_s25  ;;  %v1012_v45 = vmul.f32 %v2752_v57, %v2557_v22 }
 0x231   : > { %1320 = vrot.lane.b32.xlu2 %v1286_v16, %s2140_s25 }
 0x232   : > { %v1255_v25 = vpop.permute.xlu2 %1254  ;;  %v1156_v16 = vsub.f32 %v1012_v45, %v3233_v55 }
 0x233   : > { %v1293_v0 = vmul.f32 %v1255_v25, %v2757_v13 }
 0x235   : > { %1334 = vrot.lane.b32.xlu0 %v1293_v0, %s2140_s25  ;;  %v1263_v6 = vpop.permute.xlu0 %1262 }
 0x236   : > { %v1297_v49 = vmul.f32 %v1263_v6, %v2595_v59  ;;  %v1247_v34 = vpop.permute.xlu1 %1246 }
 0x237   : > { %v1289_v1 = vmul.f32 %v1247_v34, %v2667_v58 }
 0x238   : > { %1342 = vrot.lane.b32.xlu1 %v1297_v49, %s2140_s25  ;;  %v1015_v49 = vmul.f32 %v2780_v37, %v2621_v63 }
 0x239   : > { %1326 = vrot.lane.b32.xlu2 %v1289_v1, %s2140_s25 }
 0x23a   : > { %v1261_v31 = vpop.permute.xlu2 %1260  ;;  %v1159_v57 = vsub.f32 %v1015_v49, %v3247_v41 }
 0x23b   : > { %v1296_v11 = vmul.f32 %v1261_v31, %v2575_v43  ;;  %v3596_v31 = vld [vmem:[#allocation10_spill] sm:$0xff] }
 0x23d   : > { %1340 = vrot.lane.b32.xlu0 %v1296_v11, %s2140_s25  ;;  %v1014_v11 = vmul.f32 %v3596_v31, %v2598_v60  ;;  %v3600_v31 = vld [vmem:[#allocation9_spill] sm:$0xff] }
 0x23e   : > { %v1253_v25 = vpop.permute.xlu1 %1252 }
 0x23f   : > { %v1292_v0 = vmul.f32 %v1253_v25, %v2735_v23  ;;  %v1158_v45 = vsub.f32 %v1014_v11, %v3253_v3  ;;  %v1021_v3 = vmul.f32 %v2823_v61, %v2757_v13  ;;  %v3599_v61 = vld [vmem:[#allocation15_spill] sm:$0xff]  ;;  %v1016_v11 = vmul.f32 %v3600_v31, %v2645_v4 }
 0x240   : > { %1396 = vrot.lane.b32.xlu1 %v1156_v16, %s2144_s16  ;;  %v1018_v16 = vmul.f32 %v2804_v2, %v2690_v42  ;;  %v3598_v2 = vld [vmem:[#allocation7_spill] sm:$0xff] }
 0x241   : > { %1332 = vrot.lane.b32.xlu2 %v1292_v0, %s2140_s25  ;;  %v3597_v0 = vld [vmem:[#allocation12_spill] sm:$0xff]  ;;  %v1013_v49 = vmul.f32 %v3598_v2, %v2578_v46 }
 0x242   : > { %v1267_v34 = vpop.permute.xlu2 %1266  ;;  %v1162_v37 = vsub.f32 %v1018_v16, %v3259_v30  ;;  %v1165_v30 = vsub.f32 %v1021_v3, %v3271_v29  ;;  %v3602_v16 = vld [vmem:[#allocation11_spill] sm:$0xff] }
 0x243   : > { %v1299_v6 = vmul.f32 %v1267_v34, %v2642_v5  ;;  %v1017_v34 = vmul.f32 %v3597_v0, %v2667_v58 }
 0x245   : > { %1346 = vrot.lane.b32.xlu0 %v1299_v6, %s2140_s25  ;;  %v1161_v6 = vsub.f32 %v1017_v34, %v3265_v48 }
 0x246   : > { %v1259_v1 = vpop.permute.xlu1 %1258 }
 0x247   : > { %v1295_v55 = vmul.f32 %v1259_v1, %v2794_v40  ;;  %v1020_v1 = vmul.f32 %v2798_v17, %v2735_v23  ;;  %v3601_v17 = vld [vmem:[#allocation14_spill] sm:$0xff] }
 0x248   : > { %1402 = vrot.lane.b32.xlu1 %v1159_v57, %s2144_s16  ;;  %v1157_v57 = vsub.f32 %v1013_v49, %v3273_v26  ;;  %v1160_v26 = vsub.f32 %v1016_v11, %v3287_v54  ;;  %v3604_v54 = vld [vmem:[#allocation13_spill] sm:$0xff] }
 0x249   : > { %1338 = vrot.lane.b32.xlu2 %v1295_v55, %s2140_s25  ;;  %v1164_v48 = vsub.f32 %v1020_v1, %v3279_v51  ;;  %v1024_v55 = vmul.f32 %v3599_v61, %v2575_v43 }
 0x24b   : > { %v1168_v29 = vsub.f32 %v1024_v55, %v3285_v15  ;;  %v3603_v15 = vsub.f32 %v3297_v21, %v3299_v32  ;;  %v1221_v21 = vmul.f32 %v3321_v9, %v2578_v46  ;;  %v1222_v32 = vmul.f32 %v3317_v27, %v2598_v60 }
 0x24c   : > { %v1225_v46 = vmul.f32 %v3327_v36, %v2667_v58  ;;  %v1228_v58 = vmul.f32 %v3335_v62, %v2735_v23  ;;  %v1231_v23 = vmul.f32 %v3341_v44, %v2794_v40 }
 0x24d   : > { %1400 = vrot.lane.b32.xlu0 %v1158_v45, %s2144_s16  ;;  %v1023_v45 = vmul.f32 %v3601_v17, %v2794_v40  ;;  %v1234_v40 = vmul.f32 %v3347_v20, %v2618_v47 }
 0x24e   : > { %v1265_v41 = vpop.permute.xlu1 %1264 }
 0x24f   : > { %v1298_v25 = vmul.f32 %v1265_v41, %v2618_v47  ;;  %v1167_v51 = vsub.f32 %v1023_v45, %v3293_v10  ;;  %v3605_v10 = vsub.f32 %v3311_v19, %v3313_v52  ;;  %v1220_v52 = vmul.f32 %v3337_v14, %v2557_v22 }
 0x250   : > { %1408 = vrot.lane.b32.xlu1 %v1162_v37, %s2144_s16  ;;  %v1019_v37 = vmul.f32 %v3602_v16, %v2713_v56  ;;  %v1223_v22 = vmul.f32 %v3343_v24, %v2621_v63  ;;  %v1226_v63 = vmul.f32 %v3349_v28, %v2690_v42  ;;  %v1229_v42 = vmul.f32 %v3354_v7, %v2757_v13  ;;  %v3607_v13 = vld [vmem:[#allocation2_spill] sm:$0xff] }
 0x251   : > { %1344 = vrot.lane.b32.xlu2 %v1298_v25, %s2140_s25  ;;  %v1022_v25 = vmul.f32 %v3604_v54, %v2776_v18  ;;  %v1232_v7 = vmul.f32 %v3607_v13, %v2575_v43 }
 0x252   : > { %v1163_v41 = vsub.f32 %v1019_v37, %v3303_v39  ;;  %v3606_v39 = vsub.f32 %v3325_v33, %v3329_v50  ;;  %v1224_v50 = vmul.f32 %v3333_v38, %v2645_v4  ;;  %v1227_v4 = vmul.f32 %v3339_v53, %v2713_v56 }
 0x253   : > { %v1166_v0 = vsub.f32 %v1022_v25, %v3319_v35  ;;  %v1230_v56 = vmul.f32 %v3345_v8, %v2776_v18  ;;  %v1233_v18 = vmul.f32 %v3351_v12, %v2595_v59  ;;  %v3608_v59 = vld [vmem:[#allocation3_spill] sm:$0xff] }
 0x254   : > { %v1235_v47 = vmul.f32 %v3608_v59, %v2642_v5 }
 0x255   : > { %1406 = vrot.lane.b32.xlu0 %v1161_v6, %s2144_s16 }
 0x258   : > { %1414 = vrot.lane.b32.xlu1 %v1165_v30, %s2144_s16 }
 0x259   : > { %1398 = vrot.lane.b32.xlu2 %v1157_v57, %s2144_s16 }
 0x25d   : > { %1412 = vrot.lane.b32.xlu0 %v1164_v48, %s2144_s16 }
 0x260   : > { %1420 = vrot.lane.b32.xlu1 %v1168_v29, %s2144_s16 }
 0x261   : > { %1404 = vrot.lane.b32.xlu2 %v1160_v26, %s2144_s16 }
 0x265   : > { %1418 = vrot.lane.b32.xlu0 %v1167_v51, %s2144_s16 }
 0x268   : > { %1426 = vrot.lane.b32.xlu1 %v3603_v15, %s2144_s16 }
 0x269   : > { %1410 = vrot.lane.b32.xlu2 %v1163_v41, %s2144_s16 }
 0x26d   : > { %1424 = vrot.lane.b32.xlu0 %v3605_v10, %s2144_s16 }
 0x271   : > { %1416 = vrot.lane.b32.xlu2 %v1166_v0, %s2144_s16 }
 0x279   : > { %1422 = vrot.lane.b32.xlu2 %v3606_v39, %s2144_s16 }
 0x28a   : > { %v1319_v34 = vpop.permute.xlu1 %1318 }
 0x28b   : > { %v1321_v6 = vpop.permute.xlu2 %1320  ;;  %v1365_v3 = vadd.f32 %v1319_v34, %v1221_v21 }
 0x28c   : > { %v1366_v19 = vadd.f32 %v1321_v6, %v1222_v32 }
 0x28d   : > { %1462 = vrot.lane.b32.xlu0 %v1365_v3, %s2144_s16 }
 0x28e   : > { %1464 = vrot.lane.b32.xlu1 %v1366_v19, %s2144_s16 }
 0x28f   : > { %v1317_v35 = vpop.permute.xlu0 %1316 }
 0x290   : > { %v1364_v33 = vadd.f32 %v1317_v35, %v1220_v52 }
 0x292   : > { %1460 = vrot.lane.b32.xlu2 %v1364_v33, %s2144_s16  ;;  %v1325_v60 = vpop.permute.xlu1 %1324 }
 0x293   : > { %v1327_v27 = vpop.permute.xlu2 %1326  ;;  %v1368_v9 = vadd.f32 %v1325_v60, %v1224_v50 }
 0x294   : > { %v1369_v2 = vadd.f32 %v1327_v27, %v1225_v46 }
 0x295   : > { %1468 = vrot.lane.b32.xlu0 %v1368_v9, %s2144_s16 }
 0x296   : > { %1470 = vrot.lane.b32.xlu1 %v1369_v2, %s2144_s16 }
 0x297   : > { %v1323_v14 = vpop.permute.xlu0 %1322 }
 0x298   : > { %v1367_v49 = vadd.f32 %v1323_v14, %v1223_v22 }
 0x29a   : > { %1466 = vrot.lane.b32.xlu2 %v1367_v49, %s2144_s16  ;;  %v1331_v36 = vpop.permute.xlu1 %1330 }
 0x29b   : > { %v1333_v38 = vpop.permute.xlu2 %1332  ;;  %v1371_v30 = vadd.f32 %v1331_v36, %v1227_v4 }
 0x29c   : > { %v1372_v57 = vadd.f32 %v1333_v38, %v1228_v58 }
 0x29d   : > { %1474 = vrot.lane.b32.xlu0 %v1371_v30, %s2144_s16 }
 0x29e   : > { %1476 = vrot.lane.b32.xlu1 %v1372_v57, %s2144_s16 }
 0x29f   : > { %v1329_v24 = vpop.permute.xlu0 %1328 }
 0x2a0   : > { %v1370_v1 = vadd.f32 %v1329_v24, %v1226_v63 }
 0x2a2   : > { %1472 = vrot.lane.b32.xlu2 %v1370_v1, %s2144_s16  ;;  %v1337_v62 = vpop.permute.xlu1 %1336 }
 0x2a3   : > { %v1339_v53 = vpop.permute.xlu2 %1338  ;;  %v1374_v48 = vadd.f32 %v1337_v62, %v1230_v56 }
 0x2a4   : > { %v1375_v61 = vadd.f32 %v1339_v53, %v1231_v23 }
 0x2a5   : > { %1480 = vrot.lane.b32.xlu0 %v1374_v48, %s2144_s16 }
 0x2a6   : > { %1482 = vrot.lane.b32.xlu1 %v1375_v61, %s2144_s16 }
 0x2a7   : > { %v1335_v28 = vpop.permute.xlu0 %1334 }
 0x2a8   : > { %v1373_v55 = vadd.f32 %v1335_v28, %v1229_v42 }
 0x2aa   : > { %1478 = vrot.lane.b32.xlu2 %v1373_v55, %s2144_s16  ;;  %v1343_v44 = vpop.permute.xlu1 %1342 }
 0x2ab   : > { %v1345_v8 = vpop.permute.xlu2 %1344  ;;  %v1377_v31 = vadd.f32 %v1343_v44, %v1233_v18 }
 0x2ac   : > { %v1378_v11 = vadd.f32 %v1345_v8, %v1234_v40 }
 0x2ad   : > { %1486 = vrot.lane.b32.xlu0 %v1377_v31, %s2144_s16 }
 0x2ae   : > { %1488 = vrot.lane.b32.xlu1 %v1378_v11, %s2144_s16 }
 0x2af   : > { %v1341_v29 = vpop.permute.xlu0 %1340 }
 0x2b0   : > { %v1376_v26 = vadd.f32 %v1341_v29, %v1232_v7 }
 0x2b2   : > { %1484 = vrot.lane.b32.xlu2 %v1376_v26, %s2144_s16  ;;  %v1397_v45 = vpop.permute.xlu1 %1396 }
 0x2b3   : > { %v1399_v17 = vpop.permute.xlu2 %1398 }
 0x2b7   : > { %v1347_v20 = vpop.permute.xlu0 %1346 }
 0x2b8   : > { %v1379_v12 = vadd.f32 %v1347_v20, %v1235_v47 }
 0x2ba   : > { %1490 = vrot.lane.b32.xlu2 %v1379_v12, %s2144_s16  ;;  %v1403_v37 = vpop.permute.xlu1 %1402 }
 0x2bb   : > { %v1405_v51 = vpop.permute.xlu2 %1404 }
 0x2bf   : > { %v1401_v16 = vpop.permute.xlu0 %1400 }
 0x2c2   : > { %v1409_v15 = vpop.permute.xlu1 %1408 }
 0x2c3   : > { %v1411_v43 = vpop.permute.xlu2 %1410 }
 0x2c7   : > { %v1407_v41 = vpop.permute.xlu0 %1406 }
 0x2ca   : > { %v1415_v10 = vpop.permute.xlu1 %1414 }
 0x2cb   : > { %v1417_v54 = vpop.permute.xlu2 %1416 }
 0x2cf   : > { %v1413_v25 = vpop.permute.xlu0 %1412 }
 0x2d2   : > { %v1421_v32 = vpop.permute.xlu1 %1420 }
 0x2d3   : > { %v1423_v0 = vpop.permute.xlu2 %1422 }
 0x2d7   : > { %v1419_v39 = vpop.permute.xlu0 %1418 }
 0x2da   : > { %v1427_v19 = vpop.permute.xlu1 %1426 }
 0x2df   : > { %v1425_v3 = vpop.permute.xlu0 %1424 }
 0x2ec   : > { %v1461_v5 = vpop.permute.xlu2 %1460 }
 0x2ed   : > { %v1508_v21 = vsel %vm947_vm1, %v1397_v45, %v1461_v5 }
 0x2ee   : > { %1557 = vst.msk [vmem:[%s3507_s14] sm:$0xff] %vm1540_vm2, %v1508_v21 }
 0x2f4   : > { %v1467_v34 = vpop.permute.xlu2 %1466 }
 0x2f5   : > { %v1511_v6 = vsel %vm947_vm1, %v1403_v37, %v1467_v34 }
 0x2f6   : > { %1560 = vst.msk [vmem:[%s3507_s14 + $0x18] sm:$0xff] %vm1540_vm2, %v1511_v6 }
 0x2fc   : > { %v1473_v52 = vpop.permute.xlu2 %1472 }
 0x2fd   : > { %v1514_v35 = vsel %vm947_vm1, %v1409_v15, %v1473_v52 }
 0x2fe   : > { %1563 = vst.msk [vmem:[%s3507_s14 + $0x30] sm:$0xff] %vm1540_vm2, %v1514_v35 }
 0x2ff   : > { %v1463_v33 = vpop.permute.xlu0 %1462 }
 0x300   : > { %v1509_v50 = vsel %vm947_vm1, %v1399_v17, %v1463_v33  ;;  %v1465_v46 = vpop.permute.xlu1 %1464 }
 0x301   : > { %1558 = vst.msk [vmem:[%s3507_s14 + $0x8] sm:$0xff] %vm1540_vm2, %v1509_v50  ;;  %v1510_v60 = vsel %vm947_vm1, %v1401_v16, %v1465_v46 }
 0x302   : > { %1559 = vst.msk [vmem:[%s3507_s14 + $0x10] sm:$0xff] %vm1540_vm2, %v1510_v60 }
 0x304   : > { %v1479_v27 = vpop.permute.xlu2 %1478 }
 0x305   : > { %v1517_v9 = vsel %vm947_vm1, %v1415_v10, %v1479_v27 }
 0x306   : > { %1566 = vst.msk [vmem:[%s3507_s14 + $0x48] sm:$0xff] %vm1540_vm2, %v1517_v9 }
 0x307   : > { %v1469_v2 = vpop.permute.xlu0 %1468 }
 0x308   : > { %v1512_v22 = vsel %vm947_vm1, %v1405_v51, %v1469_v2  ;;  %v1471_v14 = vpop.permute.xlu1 %1470 }
 0x309   : > { %1561 = vst.msk [vmem:[%s3507_s14 + $0x20] sm:$0xff] %vm1540_vm2, %v1512_v22  ;;  %v1513_v49 = vsel %vm947_vm1, %v1407_v41, %v1471_v14 }
 0x30a   : > { %1562 = vst.msk [vmem:[%s3507_s14 + $0x28] sm:$0xff] %vm1540_vm2, %v1513_v49 }
 0x30c   : > { %v1485_v4 = vpop.permute.xlu2 %1484 }
 0x30d   : > { %v1520_v58 = vsel %vm947_vm1, %v1421_v32, %v1485_v4 }
 0x30e   : > { %1569 = vst.msk [vmem:[%s3507_s14 + $0x60] sm:$0xff] %vm1540_vm2, %v1520_v58 }
 0x30f   : > { %v1475_v36 = vpop.permute.xlu0 %1474 }
 0x310   : > { %v1515_v38 = vsel %vm947_vm1, %v1411_v43, %v1475_v36  ;;  %v1477_v30 = vpop.permute.xlu1 %1476 }
 0x311   : > { %1564 = vst.msk [vmem:[%s3507_s14 + $0x38] sm:$0xff] %vm1540_vm2, %v1515_v38  ;;  %v1516_v57 = vsel %vm947_vm1, %v1413_v25, %v1477_v30 }
 0x312   : > { %1565 = vst.msk [vmem:[%s3507_s14 + $0x40] sm:$0xff] %vm1540_vm2, %v1516_v57 }
 0x314   : > { %v1491_v63 = vpop.permute.xlu2 %1490 }
 0x315   : > { %v1523_v24 = vsel %vm947_vm1, %v1427_v19, %v1491_v63 }
 0x316   : > { %1572 = vst.msk [vmem:[%s3507_s14 + $0x78] sm:$0xff] %vm1540_vm2, %v1523_v24 }
 0x317   : > { %v1481_v1 = vpop.permute.xlu0 %1480 }
 0x318   : > { %v1518_v56 = vsel %vm947_vm1, %v1417_v54, %v1481_v1  ;;  %v1483_v23 = vpop.permute.xlu1 %1482 }
 0x319   : > { %1567 = vst.msk [vmem:[%s3507_s14 + $0x50] sm:$0xff] %vm1540_vm2, %v1518_v56  ;;  %v1519_v62 = vsel %vm947_vm1, %v1419_v39, %v1483_v23 }
 0x31a   : > { %1568 = vst.msk [vmem:[%s3507_s14 + $0x58] sm:$0xff] %vm1540_vm2, %v1519_v62 }
 0x31f   : > { %v1487_v53 = vpop.permute.xlu0 %1486 }
 0x320   : > { %v1521_v48 = vsel %vm947_vm1, %v1423_v0, %v1487_v53  ;;  %v1489_v61 = vpop.permute.xlu1 %1488 }
 0x321   : > { %1570 = vst.msk [vmem:[%s3507_s14 + $0x68] sm:$0xff] %vm1540_vm2, %v1521_v48  ;;  %v1522_v42 = vsel %vm947_vm1, %v1425_v3, %v1489_v61 }
 0x322   : > { %1571 = vst.msk [vmem:[%s3507_s14 + $0x70] sm:$0xff] %vm1540_vm2, %v1522_v42 }
 0x323 PF: > { %s22_s17 = sadd.s32 1, %s2138_s17  }
 0x324   : > { %p19_p4 = scmp.ge.s32.totalorder %s22_s17, 4  }
 0x326   :  { %21 = sbr.rel (!%p19_p4) target bundleno = 1 (0x1), region = 119 }

</bundles_post_ra>
